<compile_context>
chip_gen: v7x
topology: tpu7x:2x2x1
jax: 0.10.0
libtpu: 0.0.40
codegen_flags: <defaults>
</compile_context>

<pallas_src>
import math
from functools import partial

import jax
import jax.numpy as jnp
from jax import lax
from jax.experimental import pallas as pl
from jax.experimental.pallas import tpu as pltpu


# ----------------------------- generic kernels ------------------------------

def _linear_kernel(x_ref, w_ref, b_ref, o_ref, *, act):
    y = jnp.dot(x_ref[...], w_ref[...], preferred_element_type=jnp.float32)
    y = y + b_ref[...]
    if act:
        y = jnp.maximum(y, 0.0)
    o_ref[...] = y.astype(o_ref.dtype)


def linear(x, w, b, act=False, tile_m=256):
    """x: (M, K), w: (K, N), b: (N,) -> (M, N). Tiled over M."""
    M, K = x.shape
    N = w.shape[1]
    tm = M if M <= tile_m else tile_m
    return pl.pallas_call(
        partial(_linear_kernel, act=act),
        out_shape=jax.ShapeDtypeStruct((M, N), x.dtype),
        grid=(pl.cdiv(M, tm),),
        in_specs=[
            pl.BlockSpec((tm, K), lambda i: (i, 0)),
            pl.BlockSpec((K, N), lambda i: (0, 0)),
            pl.BlockSpec((1, N), lambda i: (0, 0)),
        ],
        out_specs=pl.BlockSpec((tm, N), lambda i: (i, 0)),
        compiler_params=pltpu.CompilerParams(dimension_semantics=("parallel",)),
    )(x, w, b.reshape(1, N))


def _mlp2_kernel(x_ref, w1_ref, b1_ref, w2_ref, b2_ref, o_ref, *, act):
    # Fused (x @ w1 + b1) [-> ReLU] @ w2 + b2 with the intermediate kept in VMEM.
    t = jnp.dot(x_ref[...], w1_ref[...], preferred_element_type=jnp.float32)
    t = t + b1_ref[...]
    if act:
        t = jnp.maximum(t, 0.0)
    y = jnp.dot(t, w2_ref[...], preferred_element_type=jnp.float32) + b2_ref[...]
    o_ref[...] = y.astype(o_ref.dtype)


def mlp2(x, w1, b1, w2, b2, act, tile_m=256):
    """Fused two-matmul kernel: x:(M,K) -> (M, N2). Tiled over M."""
    M, K = x.shape
    N1 = w1.shape[1]
    N2 = w2.shape[1]
    tm = M if M <= tile_m else tile_m
    return pl.pallas_call(
        partial(_mlp2_kernel, act=act),
        out_shape=jax.ShapeDtypeStruct((M, N2), x.dtype),
        grid=(pl.cdiv(M, tm),),
        in_specs=[
            pl.BlockSpec((tm, K), lambda i: (i, 0)),
            pl.BlockSpec((K, N1), lambda i: (0, 0)),
            pl.BlockSpec((1, N1), lambda i: (0, 0)),
            pl.BlockSpec((N1, N2), lambda i: (0, 0)),
            pl.BlockSpec((1, N2), lambda i: (0, 0)),
        ],
        out_specs=pl.BlockSpec((tm, N2), lambda i: (i, 0)),
        compiler_params=pltpu.CompilerParams(dimension_semantics=("parallel",)),
    )(x, w1, b1.reshape(1, N1), w2, b2.reshape(1, N2))


# --------------------------- fused transformer layer -------------------------

def _layer_kernel(h_ref, ae_ref, bias_ref,
                  ada1w_ref, ada1b_ref, wqkv_ref, bqkv_ref, wo_ref, bo_ref,
                  ada2w_ref, ada2b_ref, w1_ref, b1_ref, w2_ref, b2_ref,
                  o_ref, *, num_heads, eps):
    h = h_ref[0].astype(jnp.float32)       # (L, D)
    ae = ae_ref[0].astype(jnp.float32)     # (L, bead)
    L, D = h.shape
    H = num_heads
    hd = D // H

    # ---- adanorm 1 (adaptive LayerNorm conditioned on bead embedding) ----
    gb = jnp.dot(ae, ada1w_ref[...], preferred_element_type=jnp.float32) + ada1b_ref[...]
    g, sh = gb[:, :D], gb[:, D:]
    mu = jnp.mean(h, axis=-1, keepdims=True)
    var = jnp.mean(jnp.square(h - mu), axis=-1, keepdims=True)
    h1 = (h - mu) * lax.rsqrt(var + eps) * (1.0 + g) + sh

    # ---- fused QKV projection (1/sqrt(hd) pre-folded into the Q columns) ----
    qkv = jnp.dot(h1, wqkv_ref[...], preferred_element_type=jnp.float32) + bqkv_ref[...]
    q = qkv[:, :D]
    k = qkv[:, D:2 * D]
    v = qkv[:, 2 * D:]

    # head-major (H, L, hd) views built from static lane slices (all in VMEM)
    qh = jnp.stack([q[:, i * hd:(i + 1) * hd] for i in range(H)], axis=0)
    kh = jnp.stack([k[:, i * hd:(i + 1) * hd] for i in range(H)], axis=0)
    vh = jnp.stack([v[:, i * hd:(i + 1) * hd] for i in range(H)], axis=0)

    # ---- attention over all heads in one batched matmul ----
    s = jnp.einsum('hqd,hkd->hqk', qh, kh, preferred_element_type=jnp.float32)
    s = s + bias_ref[0]                                   # (H, L, L) shared bias
    s = s - jnp.max(s, axis=-1, keepdims=True)
    p = jnp.exp(s)
    p = p * pl.reciprocal(jnp.sum(p, axis=-1, keepdims=True), approx=True)
    att = jnp.einsum('hqk,hkd->hqd', p, vh, preferred_element_type=jnp.float32)

    # merge heads back along lanes, output projection, residual
    att_cat = jnp.concatenate([att[i] for i in range(H)], axis=-1)  # (L, D)
    h = h + jnp.dot(att_cat, wo_ref[...], preferred_element_type=jnp.float32) + bo_ref[...]

    # ---- adanorm 2 + MLP (intermediate stays in VMEM) ----
    gb2 = jnp.dot(ae, ada2w_ref[...], preferred_element_type=jnp.float32) + ada2b_ref[...]
    g2, sh2 = gb2[:, :D], gb2[:, D:]
    mu2 = jnp.mean(h, axis=-1, keepdims=True)
    var2 = jnp.mean(jnp.square(h - mu2), axis=-1, keepdims=True)
    h2 = (h - mu2) * lax.rsqrt(var2 + eps) * (1.0 + g2) + sh2

    m = jnp.dot(h2, w1_ref[...], preferred_element_type=jnp.float32) + b1_ref[...]
    m = jnp.maximum(m, 0.0)
    h = h + jnp.dot(m, w2_ref[...], preferred_element_type=jnp.float32) + b2_ref[...]

    o_ref[0] = h.astype(o_ref.dtype)


def transformer_layer(h, a_e, bias_all, layer_idx, lp, *, num_heads, eps):
    """One fused pre-norm idpGAN transformer block. h: (B, L, D)."""
    B, L, D = h.shape
    bead = a_e.shape[-1]
    mlp = lp["mlp_w1"].shape[1]
    H = num_heads

    def const(shape):
        n = len(shape)
        return pl.BlockSpec(shape, lambda b: (0,) * n)

    return pl.pallas_call(
        partial(_layer_kernel, num_heads=H, eps=eps),
        out_shape=jax.ShapeDtypeStruct((B, L, D), h.dtype),
        grid=(B,),
        in_specs=[
            pl.BlockSpec((1, L, D), lambda b: (b, 0, 0)),                    # h
            pl.BlockSpec((1, L, bead), lambda b: (b, 0, 0)),                 # a_e
            pl.BlockSpec((1, H, L, L), lambda b, li=layer_idx: (li, 0, 0, 0)),  # bias (no B broadcast)
            const((bead, 2 * D)), const((1, 2 * D)),                         # adanorm 1
            const((D, 3 * D)), const((1, 3 * D)),                            # fused QKV
            const((D, D)), const((1, D)),                                    # out proj
            const((bead, 2 * D)), const((1, 2 * D)),                         # adanorm 2
            const((D, mlp)), const((1, mlp)),                                # mlp fc1
            const((mlp, D)), const((1, D)),                                  # mlp fc2
        ],
        out_specs=pl.BlockSpec((1, L, D), lambda b: (b, 0, 0)),
        compiler_params=pltpu.CompilerParams(dimension_semantics=("parallel",)),
    )(h, a_e, bias_all,
      lp["ada1_w"], lp["ada1_b"], lp["wqkv"], lp["bqkv"], lp["wo"], lp["bo"],
      lp["ada2_w"], lp["ada2_b"], lp["mlp_w1"], lp["mlp_b1"], lp["mlp_w2"], lp["mlp_b2"])


# ----------------------------- parameter init ------------------------------

def init_params(key, cfg):
    def dense(k, shape):
        return jax.random.normal(k, shape, jnp.float32) * 0.02

    keys = iter(jax.random.split(key, 512))
    D = cfg["embed_dim"]; E = cfg["encoding_dim"]; H = cfg["num_heads"]
    bead = cfg["bead_embed_dim"]; pe = cfg["pos_embed_dim"]; r = cfg["pos_embed_r"]
    mlp = cfg["mlp_dim"]; out = cfg["output_dim"]; NL = cfg["num_layers"]
    hd = D // H
    q_scale = 1.0 / math.sqrt(hd)  # TODO(synk): assumes head-dim attention scaling

    p = {}
    # project_input: nn.Linear(encoding_dim, embed_dim)
    p["proj_w"] = dense(next(keys), (E, D)); p["proj_b"] = jnp.zeros((D,))
    # beads_embed: nn.Embedding(20, bead_embed_dim)
    p["bead_emb"] = dense(next(keys), (20, bead))
    # AF2 positional embedding: Linear(2*r+1, pos_embed_dim)
    p["pos_w"] = dense(next(keys), (2 * r + 1, pe)); p["pos_b"] = jnp.zeros((pe,))

    layers = []
    bias_ws, bias_bs = [], []
    for _ in range(NL):
        wq = dense(next(keys), (D, D)); wk = dense(next(keys), (D, D)); wv = dense(next(keys), (D, D))
        bq = jnp.zeros((D,)); bk = jnp.zeros((D,)); bv = jnp.zeros((D,))
        layers.append(dict(
            ada1_w=dense(next(keys), (bead, 2 * D)), ada1_b=jnp.zeros((1, 2 * D)),
            # fused QKV weight with the softmax scale folded into the Q block
            wqkv=jnp.concatenate([wq * q_scale, wk, wv], axis=1),
            bqkv=jnp.concatenate([bq * q_scale, bk, bv]).reshape(1, 3 * D),
            wo=dense(next(keys), (D, D)), bo=jnp.zeros((1, D)),
            ada2_w=dense(next(keys), (bead, 2 * D)), ada2_b=jnp.zeros((1, 2 * D)),
            mlp_w1=dense(next(keys), (D, mlp)), mlp_b1=jnp.zeros((1, mlp)),
            mlp_w2=dense(next(keys), (mlp, D)), mlp_b2=jnp.zeros((1, D)),
        ))
        bias_ws.append(dense(next(keys), (pe, H)))   # use_bias_2d=True, per layer
        bias_bs.append(jnp.zeros((H,)))
    p["layers"] = layers
    # All layers' positional-bias projections batched into one weight.
    p["bias2d_w_all"] = jnp.concatenate(bias_ws, axis=1)   # (pe, NL*H)
    p["bias2d_b_all"] = jnp.concatenate(bias_bs)           # (NL*H,)

    # out_module: Linear(D, D) -> ReLU -> Linear(D, output_dim)
    p["out_w1"] = dense(next(keys), (D, D)); p["out_b1"] = jnp.zeros((D,))
    p["out_w2"] = dense(next(keys), (D, out)); p["out_b2"] = jnp.zeros((out,))
    return p


# ------------------------------ forward pass -------------------------------

def ca_transformer_decoder_forward(params, cfg, x, a, r=None):
    """x: (B, L, encoding_dim) float32; a: (B, L) int32 in [0, 20)."""
    B, L, E = x.shape
    D = cfg["embed_dim"]; H = cfg["num_heads"]; NL = cfg["num_layers"]
    eps = cfg["norm_eps"]

    # project_input (+ conceptual transpose(0, 1))
    h = linear(x.reshape(B * L, E), params["proj_w"], params["proj_b"]).reshape(B, L, D)

    # beads_embed gather (plain-JAX glue)
    a_e = params["bead_emb"][a]                               # (B, L, bead)

    # AF2-style relative positional one-hot (plain-JAX glue), then ONE fused
    # double-matmul produces every layer's per-head attention bias at once.
    rmax = cfg["pos_embed_r"]
    r_ids = jnp.arange(L) if r is None else r
    rel = jnp.clip(r_ids[None, :] - r_ids[:, None], -rmax, rmax) + rmax
    onehot = jax.nn.one_hot(rel, 2 * rmax + 1, dtype=x.dtype).reshape(L * L, 2 * rmax + 1)
    bias_flat = mlp2(onehot, params["pos_w"], params["pos_b"],
                     params["bias2d_w_all"], params["bias2d_b_all"], act=False)
    bias_all = bias_flat.reshape(L, L, NL, H).transpose(2, 3, 0, 1)  # (NL, H, L, L)

    # fused transformer layers (one pallas_call each, all intermediates in VMEM)
    for li, lp in enumerate(params["layers"]):
        h = transformer_layer(h, a_e, bias_all, li, lp, num_heads=H, eps=eps)

    # out_module: Linear -> ReLU -> Linear (fused), then conceptual transpose back
    o = mlp2(h.reshape(B * L, D), params["out_w1"], params["out_b1"],
             params["out_w2"], params["out_b2"], act=True)
    return o.reshape(B, L, cfg["output_dim"])                 # (B, L, 3)


# ---------------------------------- main ------------------------------------

if __name__ == "__main__":
    cfg = dict(
        encoding_dim=16, output_dim=3, num_layers=2, embed_dim=32,
        num_heads=4, mlp_dim=128, norm_eps=1e-5,
        bead_embed_dim=8, pos_embed_dim=16, pos_embed_r=4,
    )
    key = jax.random.PRNGKey(0)
    kp, kx, ka = jax.random.split(key, 3)
    params = init_params(kp, cfg)

    B, L = 2, 8
    x = jax.random.normal(kx, (B, L, cfg["encoding_dim"]), jnp.float32)
    a = jax.random.randint(ka, (B, L), 0, 20)

    forward = jax.jit(lambda p_, x_, a_: ca_transformer_decoder_forward(p_, cfg, x_, a_))
    xyz = forward(params, x, a)
    xyz = jax.block_until_ready(xyz)
    assert xyz.shape == (B, L, cfg["output_dim"])
    assert jnp.all(jnp.isfinite(xyz))
    print("KERNEL_OK")
</pallas_src>

<mosaic_0001>
module attributes {stable_mosaic.version = 11 : i64} {
  func.func @_mlp2_kernel(%arg0: i32, %arg1: memref<64x9xf32, #tpu.memory_space<vmem>>, %arg2: memref<9x16xf32, #tpu.memory_space<vmem>>, %arg3: memref<1x16xf32, #tpu.memory_space<vmem>>, %arg4: memref<16x8xf32, #tpu.memory_space<vmem>>, %arg5: memref<1x8xf32, #tpu.memory_space<vmem>>, %arg6: memref<64x8xf32, #tpu.memory_space<vmem>>) attributes {dimension_semantics = [#tpu.dimension_semantics<parallel>], iteration_bounds = array<i64: 1>, scalar_prefetch = 0 : i64, scratch_operands = 0 : i64, tpu.core_type = #tpu.core_type<tc>, window_params = [{transform_indices = @transform_0, window_bounds = array<i64: 64, 9>}, {pipeline_mode = #tpu.pipeline_mode<synchronous>, transform_indices = @transform_1, window_bounds = array<i64: 9, 16>}, {pipeline_mode = #tpu.pipeline_mode<synchronous>, transform_indices = @transform_2, window_bounds = array<i64: 1, 16>}, {pipeline_mode = #tpu.pipeline_mode<synchronous>, transform_indices = @transform_3, window_bounds = array<i64: 16, 8>}, {pipeline_mode = #tpu.pipeline_mode<synchronous>, transform_indices = @transform_4, window_bounds = array<i64: 1, 8>}, {transform_indices = @transform_5, window_bounds = array<i64: 64, 8>}]} {
    %c0 = arith.constant 0 : index
    %c0_0 = arith.constant 0 : index
    %0 = vector.load %arg1[%c0, %c0_0] : memref<64x9xf32, #tpu.memory_space<vmem>>, vector<64x9xf32>
    %c0_1 = arith.constant 0 : index
    %c0_2 = arith.constant 0 : index
    %1 = vector.load %arg2[%c0_1, %c0_2] : memref<9x16xf32, #tpu.memory_space<vmem>>, vector<9x16xf32>
    %cst = arith.constant dense<0.000000e+00> : vector<64x16xf32>
    %2 = tpu.matmul %0, %1, %cst {dimension_numbers = #tpu.dot_dimension_numbers<[1], [0], [0], [1], [0, 0, 1, 1], [], []>} : vector<64x9xf32>, vector<9x16xf32>, vector<64x16xf32> -> vector<64x16xf32>
    %c0_3 = arith.constant 0 : index
    %c0_4 = arith.constant 0 : index
    %3 = vector.load %arg3[%c0_3, %c0_4] : memref<1x16xf32, #tpu.memory_space<vmem>>, vector<1x16xf32>
    %4 = vector.broadcast %3 : vector<1x16xf32> to vector<64x16xf32>
    %5 = arith.addf %2, %4 : vector<64x16xf32>
    %c0_5 = arith.constant 0 : index
    %c0_6 = arith.constant 0 : index
    %6 = vector.load %arg4[%c0_5, %c0_6] : memref<16x8xf32, #tpu.memory_space<vmem>>, vector<16x8xf32>
    %cst_7 = arith.constant dense<0.000000e+00> : vector<64x8xf32>
    %7 = tpu.matmul %5, %6, %cst_7 {dimension_numbers = #tpu.dot_dimension_numbers<[1], [0], [0], [1], [0, 0, 1, 1], [], []>} : vector<64x16xf32>, vector<16x8xf32>, vector<64x8xf32> -> vector<64x8xf32>
    %c0_8 = arith.constant 0 : index
    %c0_9 = arith.constant 0 : index
    %8 = vector.load %arg5[%c0_8, %c0_9] : memref<1x8xf32, #tpu.memory_space<vmem>>, vector<1x8xf32>
    %9 = vector.broadcast %8 : vector<1x8xf32> to vector<64x8xf32>
    %10 = arith.addf %7, %9 : vector<64x8xf32>
    %c0_10 = arith.constant 0 : index
    %c0_11 = arith.constant 0 : index
    %11 = vector.load %arg6[%c0_10, %c0_11] : memref<64x8xf32, #tpu.memory_space<vmem>>, vector<64x8xf32>
    tpu.vector_store %arg6[%c0_10, %c0_11], %10 {strides = array<i32>} : memref<64x8xf32, #tpu.memory_space<vmem>>, vector<64x8xf32>,
    return
  }
  func.func @transform_0(%arg0: i32) -> (i32, i32) {
    %c0_i32 = arith.constant 0 : i32
    %c0_i32_0 = arith.constant 0 : i32
    return %arg0, %c0_i32 : i32, i32
  }
  func.func @transform_1(%arg0: i32) -> (i32, i32) {
    %c0_i32 = arith.constant 0 : i32
    %c0_i32_0 = arith.constant 0 : i32
    %c0_i32_1 = arith.constant 0 : i32
    return %c0_i32, %c0_i32_0 : i32, i32
  }
  func.func @transform_2(%arg0: i32) -> (i32, i32) {
    %c0_i32 = arith.constant 0 : i32
    %c0_i32_0 = arith.constant 0 : i32
    %c0_i32_1 = arith.constant 0 : i32
    return %c0_i32, %c0_i32_0 : i32, i32
  }
  func.func @transform_3(%arg0: i32) -> (i32, i32) {
    %c0_i32 = arith.constant 0 : i32
    %c0_i32_0 = arith.constant 0 : i32
    %c0_i32_1 = arith.constant 0 : i32
    return %c0_i32, %c0_i32_0 : i32, i32
  }
  func.func @transform_4(%arg0: i32) -> (i32, i32) {
    %c0_i32 = arith.constant 0 : i32
    %c0_i32_0 = arith.constant 0 : i32
    %c0_i32_1 = arith.constant 0 : i32
    return %c0_i32, %c0_i32_0 : i32, i32
  }
  func.func @transform_5(%arg0: i32) -> (i32, i32) {
    %c0_i32 = arith.constant 0 : i32
    %c0_i32_0 = arith.constant 0 : i32
    return %arg0, %c0_i32 : i32, i32
  }
}

module attributes {stable_mosaic.version = 11 : i64} {
  func.func @_linear_kernel(%arg0: i32, %arg1: memref<16x16xf32, #tpu.memory_space<vmem>>, %arg2: memref<16x32xf32, #tpu.memory_space<vmem>>, %arg3: memref<1x32xf32, #tpu.memory_space<vmem>>, %arg4: memref<16x32xf32, #tpu.memory_space<vmem>>) attributes {dimension_semantics = [#tpu.dimension_semantics<parallel>], iteration_bounds = array<i64: 1>, scalar_prefetch = 0 : i64, scratch_operands = 0 : i64, tpu.core_type = #tpu.core_type<tc>, window_params = [{transform_indices = @transform_0, window_bounds = array<i64: 16, 16>}, {pipeline_mode = #tpu.pipeline_mode<synchronous>, transform_indices = @transform_1, window_bounds = array<i64: 16, 32>}, {pipeline_mode = #tpu.pipeline_mode<synchronous>, transform_indices = @transform_2, window_bounds = array<i64: 1, 32>}, {transform_indices = @transform_3, window_bounds = array<i64: 16, 32>}]} {
    %c0 = arith.constant 0 : index
    %c0_0 = arith.constant 0 : index
    %0 = vector.load %arg1[%c0, %c0_0] : memref<16x16xf32, #tpu.memory_space<vmem>>, vector<16x16xf32>
    %c0_1 = arith.constant 0 : index
    %c0_2 = arith.constant 0 : index
    %1 = vector.load %arg2[%c0_1, %c0_2] : memref<16x32xf32, #tpu.memory_space<vmem>>, vector<16x32xf32>
    %cst = arith.constant dense<0.000000e+00> : vector<16x32xf32>
    %2 = tpu.matmul %0, %1, %cst {dimension_numbers = #tpu.dot_dimension_numbers<[1], [0], [0], [1], [0, 0, 1, 1], [], []>} : vector<16x16xf32>, vector<16x32xf32>, vector<16x32xf32> -> vector<16x32xf32>
    %c0_3 = arith.constant 0 : index
    %c0_4 = arith.constant 0 : index
    %3 = vector.load %arg3[%c0_3, %c0_4] : memref<1x32xf32, #tpu.memory_space<vmem>>, vector<1x32xf32>
    %4 = vector.broadcast %3 : vector<1x32xf32> to vector<16x32xf32>
    %5 = arith.addf %2, %4 : vector<16x32xf32>
    %c0_5 = arith.constant 0 : index
    %c0_6 = arith.constant 0 : index
    %6 = vector.load %arg4[%c0_5, %c0_6] : memref<16x32xf32, #tpu.memory_space<vmem>>, vector<16x32xf32>
    tpu.vector_store %arg4[%c0_5, %c0_6], %5 {strides = array<i32>} : memref<16x32xf32, #tpu.memory_space<vmem>>, vector<16x32xf32>,
    return
  }
  func.func @transform_0(%arg0: i32) -> (i32, i32) {
    %c0_i32 = arith.constant 0 : i32
    %c0_i32_0 = arith.constant 0 : i32
    return %arg0, %c0_i32 : i32, i32
  }
  func.func @transform_1(%arg0: i32) -> (i32, i32) {
    %c0_i32 = arith.constant 0 : i32
    %c0_i32_0 = arith.constant 0 : i32
    %c0_i32_1 = arith.constant 0 : i32
    return %c0_i32, %c0_i32_0 : i32, i32
  }
  func.func @transform_2(%arg0: i32) -> (i32, i32) {
    %c0_i32 = arith.constant 0 : i32
    %c0_i32_0 = arith.constant 0 : i32
    %c0_i32_1 = arith.constant 0 : i32
    return %c0_i32, %c0_i32_0 : i32, i32
  }
  func.func @transform_3(%arg0: i32) -> (i32, i32) {
    %c0_i32 = arith.constant 0 : i32
    %c0_i32_0 = arith.constant 0 : i32
    return %arg0, %c0_i32 : i32, i32
  }
}

module attributes {stable_mosaic.version = 11 : i64} {
  func.func @_layer_kernel(%arg0: i32, %arg1: memref<1x8x32xf32, #tpu.memory_space<vmem>>, %arg2: memref<1x8x8xf32, #tpu.memory_space<vmem>>, %arg3: memref<1x4x8x8xf32, #tpu.memory_space<vmem>>, %arg4: memref<8x64xf32, #tpu.memory_space<vmem>>, %arg5: memref<1x64xf32, #tpu.memory_space<vmem>>, %arg6: memref<32x96xf32, #tpu.memory_space<vmem>>, %arg7: memref<1x96xf32, #tpu.memory_space<vmem>>, %arg8: memref<32x32xf32, #tpu.memory_space<vmem>>, %arg9: memref<1x32xf32, #tpu.memory_space<vmem>>, %arg10: memref<8x64xf32, #tpu.memory_space<vmem>>, %arg11: memref<1x64xf32, #tpu.memory_space<vmem>>, %arg12: memref<32x128xf32, #tpu.memory_space<vmem>>, %arg13: memref<1x128xf32, #tpu.memory_space<vmem>>, %arg14: memref<128x32xf32, #tpu.memory_space<vmem>>, %arg15: memref<1x32xf32, #tpu.memory_space<vmem>>, %arg16: memref<1x8x32xf32, #tpu.memory_space<vmem>>) attributes {dimension_semantics = [#tpu.dimension_semantics<parallel>], iteration_bounds = array<i64: 2>, scalar_prefetch = 0 : i64, scratch_operands = 0 : i64, tpu.core_type = #tpu.core_type<tc>, window_params = [{transform_indices = @transform_0, window_bounds = array<i64: 1, 8, 32>}, {transform_indices = @transform_1, window_bounds = array<i64: 1, 8, 8>}, {transform_indices = @transform_2, window_bounds = array<i64: 1, 4, 8, 8>}, {pipeline_mode = #tpu.pipeline_mode<synchronous>, transform_indices = @transform_3, window_bounds = array<i64: 8, 64>}, {pipeline_mode = #tpu.pipeline_mode<synchronous>, transform_indices = @transform_4, window_bounds = array<i64: 1, 64>}, {pipeline_mode = #tpu.pipeline_mode<synchronous>, transform_indices = @transform_5, window_bounds = array<i64: 32, 96>}, {pipeline_mode = #tpu.pipeline_mode<synchronous>, transform_indices = @transform_6, window_bounds = array<i64: 1, 96>}, {pipeline_mode = #tpu.pipeline_mode<synchronous>, transform_indices = @transform_7, window_bounds = array<i64: 32, 32>}, {pipeline_mode = #tpu.pipeline_mode<synchronous>, transform_indices = @transform_8, window_bounds = array<i64: 1, 32>}, {pipeline_mode = #tpu.pipeline_mode<synchronous>, transform_indices = @transform_9, window_bounds = array<i64: 8, 64>}, {pipeline_mode = #tpu.pipeline_mode<synchronous>, transform_indices = @transform_10, window_bounds = array<i64: 1, 64>}, {pipeline_mode = #tpu.pipeline_mode<synchronous>, transform_indices = @transform_11, window_bounds = array<i64: 32, 128>}, {pipeline_mode = #tpu.pipeline_mode<synchronous>, transform_indices = @transform_12, window_bounds = array<i64: 1, 128>}, {pipeline_mode = #tpu.pipeline_mode<synchronous>, transform_indices = @transform_13, window_bounds = array<i64: 128, 32>}, {pipeline_mode = #tpu.pipeline_mode<synchronous>, transform_indices = @transform_14, window_bounds = array<i64: 1, 32>}, {transform_indices = @transform_15, window_bounds = array<i64: 1, 8, 32>}]} {
    %c0 = arith.constant 0 : index
    %c0_0 = arith.constant 0 : index
    %c0_1 = arith.constant 0 : index
    %0 = vector.load %arg1[%c0, %c0_0, %c0_1] : memref<1x8x32xf32, #tpu.memory_space<vmem>>, vector<1x8x32xf32>
    %1 = vector.shape_cast %0 : vector<1x8x32xf32> to vector<8x32xf32>
    %c0_2 = arith.constant 0 : index
    %c0_3 = arith.constant 0 : index
    %c0_4 = arith.constant 0 : index
    %2 = vector.load %arg2[%c0_2, %c0_3, %c0_4] : memref<1x8x8xf32, #tpu.memory_space<vmem>>, vector<1x8x8xf32>
    %3 = vector.shape_cast %2 : vector<1x8x8xf32> to vector<8x8xf32>
    %c0_5 = arith.constant 0 : index
    %c0_6 = arith.constant 0 : index
    %4 = vector.load %arg4[%c0_5, %c0_6] : memref<8x64xf32, #tpu.memory_space<vmem>>, vector<8x64xf32>
    %cst = arith.constant dense<0.000000e+00> : vector<8x64xf32>
    %5 = tpu.matmul %3, %4, %cst {dimension_numbers = #tpu.dot_dimension_numbers<[1], [0], [0], [1], [0, 0, 1, 1], [], []>} : vector<8x8xf32>, vector<8x64xf32>, vector<8x64xf32> -> vector<8x64xf32>
    %c0_7 = arith.constant 0 : index
    %c0_8 = arith.constant 0 : index
    %6 = vector.load %arg5[%c0_7, %c0_8] : memref<1x64xf32, #tpu.memory_space<vmem>>, vector<1x64xf32>
    %7 = vector.broadcast %6 : vector<1x64xf32> to vector<8x64xf32>
    %8 = arith.addf %5, %7 : vector<8x64xf32>
    %9 = vector.extract_strided_slice %8 {offsets = [0, 0], sizes = [8, 32], strides = [1, 1]} : vector<8x64xf32> to vector<8x32xf32>
    %10 = vector.extract_strided_slice %8 {offsets = [0, 32], sizes = [8, 32], strides = [1, 1]} : vector<8x64xf32> to vector<8x32xf32>
    %cst_9 = arith.constant dense<0.000000e+00> : vector<8xf32>
    %11 = vector.multi_reduction <add>, %1, %cst_9 [1] : vector<8x32xf32> to vector<8xf32>
    %12 = vector.shape_cast %11 : vector<8xf32> to vector<8x1xf32>
    %cst_10 = arith.constant 3.200000e+01 : f32
    %13 = vector.broadcast %cst_10 : f32 to vector<8x1xf32>
    %14 = arith.divf %12, %13 : vector<8x1xf32>
    %15 = vector.broadcast %14 : vector<8x1xf32> to vector<8x32xf32>
    %16 = arith.subf %1, %15 : vector<8x32xf32>
    %17 = arith.mulf %16, %16 : vector<8x32xf32>
    %cst_11 = arith.constant dense<0.000000e+00> : vector<8xf32>
    %18 = vector.multi_reduction <add>, %17, %cst_11 [1] : vector<8x32xf32> to vector<8xf32>
    %19 = vector.shape_cast %18 : vector<8xf32> to vector<8x1xf32>
    %cst_12 = arith.constant 3.200000e+01 : f32
    %20 = vector.broadcast %cst_12 : f32 to vector<8x1xf32>
    %21 = arith.divf %19, %20 : vector<8x1xf32>
    %22 = vector.broadcast %14 : vector<8x1xf32> to vector<8x32xf32>
    %23 = arith.subf %1, %22 : vector<8x32xf32>
    %cst_13 = arith.constant 9.99999974E-6 : f32
    %24 = vector.broadcast %cst_13 : f32 to vector<8x1xf32>
    %25 = arith.addf %21, %24 : vector<8x1xf32>
    %26 = math.rsqrt %25 : vector<8x1xf32>
    %27 = vector.broadcast %26 : vector<8x1xf32> to vector<8x32xf32>
    %28 = arith.mulf %23, %27 : vector<8x32xf32>
    %cst_14 = arith.constant 1.000000e+00 : f32
    %29 = vector.broadcast %cst_14 : f32 to vector<8x32xf32>
    %30 = arith.addf %29, %9 : vector<8x32xf32>
    %31 = arith.mulf %28, %30 : vector<8x32xf32>
    %32 = arith.addf %31, %10 : vector<8x32xf32>
    %c0_15 = arith.constant 0 : index
    %c0_16 = arith.constant 0 : index
    %33 = vector.load %arg6[%c0_15, %c0_16] : memref<32x96xf32, #tpu.memory_space<vmem>>, vector<32x96xf32>
    %cst_17 = arith.constant dense<0.000000e+00> : vector<8x96xf32>
    %34 = tpu.matmul %32, %33, %cst_17 {dimension_numbers = #tpu.dot_dimension_numbers<[1], [0], [0], [1], [0, 0, 1, 1], [], []>} : vector<8x32xf32>, vector<32x96xf32>, vector<8x96xf32> -> vector<8x96xf32>
    %c0_18 = arith.constant 0 : index
    %c0_19 = arith.constant 0 : index
    %35 = vector.load %arg7[%c0_18, %c0_19] : memref<1x96xf32, #tpu.memory_space<vmem>>, vector<1x96xf32>
    %36 = vector.broadcast %35 : vector<1x96xf32> to vector<8x96xf32>
    %37 = arith.addf %34, %36 : vector<8x96xf32>
    %38 = vector.extract_strided_slice %37 {offsets = [0, 0], sizes = [8, 32], strides = [1, 1]} : vector<8x96xf32> to vector<8x32xf32>
    %39 = vector.extract_strided_slice %37 {offsets = [0, 32], sizes = [8, 32], strides = [1, 1]} : vector<8x96xf32> to vector<8x32xf32>
    %40 = vector.extract_strided_slice %37 {offsets = [0, 64], sizes = [8, 32], strides = [1, 1]} : vector<8x96xf32> to vector<8x32xf32>
    %41 = vector.extract_strided_slice %38 {offsets = [0, 0], sizes = [8, 8], strides = [1, 1]} : vector<8x32xf32> to vector<8x8xf32>
    %42 = vector.extract_strided_slice %38 {offsets = [0, 8], sizes = [8, 8], strides = [1, 1]} : vector<8x32xf32> to vector<8x8xf32>
    %43 = vector.extract_strided_slice %38 {offsets = [0, 16], sizes = [8, 8], strides = [1, 1]} : vector<8x32xf32> to vector<8x8xf32>
    %44 = vector.extract_strided_slice %38 {offsets = [0, 24], sizes = [8, 8], strides = [1, 1]} : vector<8x32xf32> to vector<8x8xf32>
    %45 = vector.shape_cast %41 : vector<8x8xf32> to vector<1x8x8xf32>
    %46 = vector.shape_cast %42 : vector<8x8xf32> to vector<1x8x8xf32>
    %47 = vector.shape_cast %43 : vector<8x8xf32> to vector<1x8x8xf32>
    %48 = vector.shape_cast %44 : vector<8x8xf32> to vector<1x8x8xf32>
    %49 = tpu.concatenate %45, %46, %47, %48 in 0 : vector<1x8x8xf32>, vector<1x8x8xf32>, vector<1x8x8xf32>, vector<1x8x8xf32> -> vector<4x8x8xf32>
    %50 = vector.extract_strided_slice %39 {offsets = [0, 0], sizes = [8, 8], strides = [1, 1]} : vector<8x32xf32> to vector<8x8xf32>
    %51 = vector.extract_strided_slice %39 {offsets = [0, 8], sizes = [8, 8], strides = [1, 1]} : vector<8x32xf32> to vector<8x8xf32>
    %52 = vector.extract_strided_slice %39 {offsets = [0, 16], sizes = [8, 8], strides = [1, 1]} : vector<8x32xf32> to vector<8x8xf32>
    %53 = vector.extract_strided_slice %39 {offsets = [0, 24], sizes = [8, 8], strides = [1, 1]} : vector<8x32xf32> to vector<8x8xf32>
    %54 = vector.shape_cast %50 : vector<8x8xf32> to vector<1x8x8xf32>
    %55 = vector.shape_cast %51 : vector<8x8xf32> to vector<1x8x8xf32>
    %56 = vector.shape_cast %52 : vector<8x8xf32> to vector<1x8x8xf32>
    %57 = vector.shape_cast %53 : vector<8x8xf32> to vector<1x8x8xf32>
    %58 = tpu.concatenate %54, %55, %56, %57 in 0 : vector<1x8x8xf32>, vector<1x8x8xf32>, vector<1x8x8xf32>, vector<1x8x8xf32> -> vector<4x8x8xf32>
    %59 = vector.extract_strided_slice %40 {offsets = [0, 0], sizes = [8, 8], strides = [1, 1]} : vector<8x32xf32> to vector<8x8xf32>
    %60 = vector.extract_strided_slice %40 {offsets = [0, 8], sizes = [8, 8], strides = [1, 1]} : vector<8x32xf32> to vector<8x8xf32>
    %61 = vector.extract_strided_slice %40 {offsets = [0, 16], sizes = [8, 8], strides = [1, 1]} : vector<8x32xf32> to vector<8x8xf32>
    %62 = vector.extract_strided_slice %40 {offsets = [0, 24], sizes = [8, 8], strides = [1, 1]} : vector<8x32xf32> to vector<8x8xf32>
    %63 = vector.shape_cast %59 : vector<8x8xf32> to vector<1x8x8xf32>
    %64 = vector.shape_cast %60 : vector<8x8xf32> to vector<1x8x8xf32>
    %65 = vector.shape_cast %61 : vector<8x8xf32> to vector<1x8x8xf32>
    %66 = vector.shape_cast %62 : vector<8x8xf32> to vector<1x8x8xf32>
    %67 = tpu.concatenate %63, %64, %65, %66 in 0 : vector<1x8x8xf32>, vector<1x8x8xf32>, vector<1x8x8xf32>, vector<1x8x8xf32> -> vector<4x8x8xf32>
    "tpu.trace_start"() <{level = 10 : i32, message = "hqd,hkd->hqk"}> : () -> ()
    %cst_20 = arith.constant dense<0.000000e+00> : vector<4x8x8xf32>
    %68 = tpu.matmul %49, %58, %cst_20 {dimension_numbers = #tpu.dot_dimension_numbers<[2], [2], [1], [1], [0, 0, 0, 1, 1, 1], [0], [0]>} : vector<4x8x8xf32>, vector<4x8x8xf32>, vector<4x8x8xf32> -> vector<4x8x8xf32>
    "tpu.trace_stop"() : () -> ()
    %c0_21 = arith.constant 0 : index
    %c0_22 = arith.constant 0 : index
    %c0_23 = arith.constant 0 : index
    %c0_24 = arith.constant 0 : index
    %69 = vector.load %arg3[%c0_21, %c0_22, %c0_23, %c0_24] : memref<1x4x8x8xf32, #tpu.memory_space<vmem>>, vector<1x4x8x8xf32>
    %70 = vector.shape_cast %69 : vector<1x4x8x8xf32> to vector<4x8x8xf32>
    %71 = arith.addf %68, %70 : vector<4x8x8xf32>
    %cst_25 = arith.constant dense<0xFF800000> : vector<4x8xf32>
    %72 = vector.multi_reduction <maximumf>, %71, %cst_25 [2] : vector<4x8x8xf32> to vector<4x8xf32>
    %73 = vector.shape_cast %72 : vector<4x8xf32> to vector<4x8x1xf32>
    %74 = vector.broadcast %73 : vector<4x8x1xf32> to vector<4x8x8xf32>
    %75 = arith.subf %71, %74 : vector<4x8x8xf32>
    %76 = math.exp %75 : vector<4x8x8xf32>
    %cst_26 = arith.constant dense<0.000000e+00> : vector<4x8xf32>
    %77 = vector.multi_reduction <add>, %76, %cst_26 [2] : vector<4x8x8xf32> to vector<4x8xf32>
    %78 = vector.shape_cast %77 : vector<4x8xf32> to vector<4x8x1xf32>
    %79 = tpu.reciprocal %78 {approx = true} : vector<4x8x1xf32> -> vector<4x8x1xf32>
    %80 = vector.broadcast %79 : vector<4x8x1xf32> to vector<4x8x8xf32>
    %81 = arith.mulf %76, %80 : vector<4x8x8xf32>
    "tpu.trace_start"() <{level = 10 : i32, message = "hqk,hkd->hqd"}> : () -> ()
    %cst_27 = arith.constant dense<0.000000e+00> : vector<4x8x8xf32>
    %82 = tpu.matmul %81, %67, %cst_27 {dimension_numbers = #tpu.dot_dimension_numbers<[2], [1], [1], [2], [0, 0, 0, 1, 1, 2], [0], [0]>} : vector<4x8x8xf32>, vector<4x8x8xf32>, vector<4x8x8xf32> -> vector<4x8x8xf32>
    "tpu.trace_stop"() : () -> ()
    %83 = vector.extract_strided_slice %82 {offsets = [0, 0, 0], sizes = [1, 8, 8], strides = [1, 1, 1]} : vector<4x8x8xf32> to vector<1x8x8xf32>
    %84 = vector.shape_cast %83 : vector<1x8x8xf32> to vector<8x8xf32>
    %85 = vector.extract_strided_slice %82 {offsets = [1, 0, 0], sizes = [1, 8, 8], strides = [1, 1, 1]} : vector<4x8x8xf32> to vector<1x8x8xf32>
    %86 = vector.shape_cast %85 : vector<1x8x8xf32> to vector<8x8xf32>
    %87 = vector.extract_strided_slice %82 {offsets = [2, 0, 0], sizes = [1, 8, 8], strides = [1, 1, 1]} : vector<4x8x8xf32> to vector<1x8x8xf32>
    %88 = vector.shape_cast %87 : vector<1x8x8xf32> to vector<8x8xf32>
    %89 = vector.extract_strided_slice %82 {offsets = [3, 0, 0], sizes = [1, 8, 8], strides = [1, 1, 1]} : vector<4x8x8xf32> to vector<1x8x8xf32>
    %90 = vector.shape_cast %89 : vector<1x8x8xf32> to vector<8x8xf32>
    %91 = tpu.concatenate %84, %86, %88, %90 in 1 : vector<8x8xf32>, vector<8x8xf32>, vector<8x8xf32>, vector<8x8xf32> -> vector<8x32xf32>
    %c0_28 = arith.constant 0 : index
    %c0_29 = arith.constant 0 : index
    %92 = vector.load %arg8[%c0_28, %c0_29] : memref<32x32xf32, #tpu.memory_space<vmem>>, vector<32x32xf32>
    %cst_30 = arith.constant dense<0.000000e+00> : vector<8x32xf32>
    %93 = tpu.matmul %91, %92, %cst_30 {dimension_numbers = #tpu.dot_dimension_numbers<[1], [0], [0], [1], [0, 0, 1, 1], [], []>} : vector<8x32xf32>, vector<32x32xf32>, vector<8x32xf32> -> vector<8x32xf32>
    %94 = arith.addf %1, %93 : vector<8x32xf32>
    %c0_31 = arith.constant 0 : index
    %c0_32 = arith.constant 0 : index
    %95 = vector.load %arg9[%c0_31, %c0_32] : memref<1x32xf32, #tpu.memory_space<vmem>>, vector<1x32xf32>
    %96 = vector.broadcast %95 : vector<1x32xf32> to vector<8x32xf32>
    %97 = arith.addf %94, %96 : vector<8x32xf32>
    %c0_33 = arith.constant 0 : index
    %c0_34 = arith.constant 0 : index
    %98 = vector.load %arg10[%c0_33, %c0_34] : memref<8x64xf32, #tpu.memory_space<vmem>>, vector<8x64xf32>
    %cst_35 = arith.constant dense<0.000000e+00> : vector<8x64xf32>
    %99 = tpu.matmul %3, %98, %cst_35 {dimension_numbers = #tpu.dot_dimension_numbers<[1], [0], [0], [1], [0, 0, 1, 1], [], []>} : vector<8x8xf32>, vector<8x64xf32>, vector<8x64xf32> -> vector<8x64xf32>
    %c0_36 = arith.constant 0 : index
    %c0_37 = arith.constant 0 : index
    %100 = vector.load %arg11[%c0_36, %c0_37] : memref<1x64xf32, #tpu.memory_space<vmem>>, vector<1x64xf32>
    %101 = vector.broadcast %100 : vector<1x64xf32> to vector<8x64xf32>
    %102 = arith.addf %99, %101 : vector<8x64xf32>
    %103 = vector.extract_strided_slice %102 {offsets = [0, 0], sizes = [8, 32], strides = [1, 1]} : vector<8x64xf32> to vector<8x32xf32>
    %104 = vector.extract_strided_slice %102 {offsets = [0, 32], sizes = [8, 32], strides = [1, 1]} : vector<8x64xf32> to vector<8x32xf32>
    %cst_38 = arith.constant dense<0.000000e+00> : vector<8xf32>
    %105 = vector.multi_reduction <add>, %97, %cst_38 [1] : vector<8x32xf32> to vector<8xf32>
    %106 = vector.shape_cast %105 : vector<8xf32> to vector<8x1xf32>
    %cst_39 = arith.constant 3.200000e+01 : f32
    %107 = vector.broadcast %cst_39 : f32 to vector<8x1xf32>
    %108 = arith.divf %106, %107 : vector<8x1xf32>
    %109 = vector.broadcast %108 : vector<8x1xf32> to vector<8x32xf32>
    %110 = arith.subf %97, %109 : vector<8x32xf32>
    %111 = arith.mulf %110, %110 : vector<8x32xf32>
    %cst_40 = arith.constant dense<0.000000e+00> : vector<8xf32>
    %112 = vector.multi_reduction <add>, %111, %cst_40 [1] : vector<8x32xf32> to vector<8xf32>
    %113 = vector.shape_cast %112 : vector<8xf32> to vector<8x1xf32>
    %cst_41 = arith.constant 3.200000e+01 : f32
    %114 = vector.broadcast %cst_41 : f32 to vector<8x1xf32>
    %115 = arith.divf %113, %114 : vector<8x1xf32>
    %116 = vector.broadcast %108 : vector<8x1xf32> to vector<8x32xf32>
    %117 = arith.subf %97, %116 : vector<8x32xf32>
    %cst_42 = arith.constant 9.99999974E-6 : f32
    %118 = vector.broadcast %cst_42 : f32 to vector<8x1xf32>
    %119 = arith.addf %115, %118 : vector<8x1xf32>
    %120 = math.rsqrt %119 : vector<8x1xf32>
    %121 = vector.broadcast %120 : vector<8x1xf32> to vector<8x32xf32>
    %122 = arith.mulf %117, %121 : vector<8x32xf32>
    %cst_43 = arith.constant 1.000000e+00 : f32
    %123 = vector.broadcast %cst_43 : f32 to vector<8x32xf32>
    %124 = arith.addf %123, %103 : vector<8x32xf32>
    %125 = arith.mulf %122, %124 : vector<8x32xf32>
    %126 = arith.addf %125, %104 : vector<8x32xf32>
    %c0_44 = arith.constant 0 : index
    %c0_45 = arith.constant 0 : index
    %127 = vector.load %arg12[%c0_44, %c0_45] : memref<32x128xf32, #tpu.memory_space<vmem>>, vector<32x128xf32>
    %cst_46 = arith.constant dense<0.000000e+00> : vector<8x128xf32>
    %128 = tpu.matmul %126, %127, %cst_46 {dimension_numbers = #tpu.dot_dimension_numbers<[1], [0], [0], [1], [0, 0, 1, 1], [], []>} : vector<8x32xf32>, vector<32x128xf32>, vector<8x128xf32> -> vector<8x128xf32>
    %c0_47 = arith.constant 0 : index
    %c0_48 = arith.constant 0 : index
    %129 = vector.load %arg13[%c0_47, %c0_48] : memref<1x128xf32, #tpu.memory_space<vmem>>, vector<1x128xf32>
    %130 = vector.broadcast %129 : vector<1x128xf32> to vector<8x128xf32>
    %131 = arith.addf %128, %130 : vector<8x128xf32>
    %cst_49 = arith.constant 0.000000e+00 : f32
    %132 = vector.broadcast %cst_49 : f32 to vector<8x128xf32>
    %133 = arith.maximumf %131, %132 : vector<8x128xf32>
    %c0_50 = arith.constant 0 : index
    %c0_51 = arith.constant 0 : index
    %134 = vector.load %arg14[%c0_50, %c0_51] : memref<128x32xf32, #tpu.memory_space<vmem>>, vector<128x32xf32>
    %cst_52 = arith.constant dense<0.000000e+00> : vector<8x32xf32>
    %135 = tpu.matmul %133, %134, %cst_52 {dimension_numbers = #tpu.dot_dimension_numbers<[1], [0], [0], [1], [0, 0, 1, 1], [], []>} : vector<8x128xf32>, vector<128x32xf32>, vector<8x32xf32> -> vector<8x32xf32>
    %136 = arith.addf %97, %135 : vector<8x32xf32>
    %c0_53 = arith.constant 0 : index
    %c0_54 = arith.constant 0 : index
    %137 = vector.load %arg15[%c0_53, %c0_54] : memref<1x32xf32, #tpu.memory_space<vmem>>, vector<1x32xf32>
    %138 = vector.broadcast %137 : vector<1x32xf32> to vector<8x32xf32>
    %139 = arith.addf %136, %138 : vector<8x32xf32>
    %c0_55 = arith.constant 0 : index
    %c0_56 = arith.constant 0 : index
    %c0_57 = arith.constant 0 : index
    %140 = vector.load %arg16[%c0_55, %c0_56, %c0_57] : memref<1x8x32xf32, #tpu.memory_space<vmem>>, vector<1x8x32xf32>
    %141 = vector.shape_cast %140 : vector<1x8x32xf32> to vector<8x32xf32>
    %142 = vector.shape_cast %139 : vector<8x32xf32> to vector<1x8x32xf32>
    tpu.vector_store %arg16[%c0_55, %c0_56, %c0_57], %142 {strides = array<i32>} : memref<1x8x32xf32, #tpu.memory_space<vmem>>, vector<1x8x32xf32>,
    return
  }
  func.func @transform_0(%arg0: i32) -> (i32, i32, i32) {
    %c0_i32 = arith.constant 0 : i32
    %c0_i32_0 = arith.constant 0 : i32
    %c0_i32_1 = arith.constant 0 : i32
    return %arg0, %c0_i32, %c0_i32_0 : i32, i32, i32
  }
  func.func @transform_1(%arg0: i32) -> (i32, i32, i32) {
    %c0_i32 = arith.constant 0 : i32
    %c0_i32_0 = arith.constant 0 : i32
    %c0_i32_1 = arith.constant 0 : i32
    return %arg0, %c0_i32, %c0_i32_0 : i32, i32, i32
  }
  func.func @transform_2(%arg0: i32) -> (i32, i32, i32, i32) {
    %c0_i32 = arith.constant 0 : i32
    %c0_i32_0 = arith.constant 0 : i32
    %c0_i32_1 = arith.constant 0 : i32
    %c0_i32_2 = arith.constant 0 : i32
    %c0_i32_3 = arith.constant 0 : i32
    return %c0_i32, %c0_i32_0, %c0_i32_1, %c0_i32_2 : i32, i32, i32, i32
  }
  func.func @transform_3(%arg0: i32) -> (i32, i32) {
    %c0_i32 = arith.constant 0 : i32
    %c0_i32_0 = arith.constant 0 : i32
    %c0_i32_1 = arith.constant 0 : i32
    return %c0_i32, %c0_i32_0 : i32, i32
  }
  func.func @transform_4(%arg0: i32) -> (i32, i32) {
    %c0_i32 = arith.constant 0 : i32
    %c0_i32_0 = arith.constant 0 : i32
    %c0_i32_1 = arith.constant 0 : i32
    return %c0_i32, %c0_i32_0 : i32, i32
  }
  func.func @transform_5(%arg0: i32) -> (i32, i32) {
    %c0_i32 = arith.constant 0 : i32
    %c0_i32_0 = arith.constant 0 : i32
    %c0_i32_1 = arith.constant 0 : i32
    return %c0_i32, %c0_i32_0 : i32, i32
  }
  func.func @transform_6(%arg0: i32) -> (i32, i32) {
    %c0_i32 = arith.constant 0 : i32
    %c0_i32_0 = arith.constant 0 : i32
    %c0_i32_1 = arith.constant 0 : i32
    return %c0_i32, %c0_i32_0 : i32, i32
  }
  func.func @transform_7(%arg0: i32) -> (i32, i32) {
    %c0_i32 = arith.constant 0 : i32
    %c0_i32_0 = arith.constant 0 : i32
    %c0_i32_1 = arith.constant 0 : i32
    return %c0_i32, %c0_i32_0 : i32, i32
  }
  func.func @transform_8(%arg0: i32) -> (i32, i32) {
    %c0_i32 = arith.constant 0 : i32
    %c0_i32_0 = arith.constant 0 : i32
    %c0_i32_1 = arith.constant 0 : i32
    return %c0_i32, %c0_i32_0 : i32, i32
  }
  func.func @transform_9(%arg0: i32) -> (i32, i32) {
    %c0_i32 = arith.constant 0 : i32
    %c0_i32_0 = arith.constant 0 : i32
    %c0_i32_1 = arith.constant 0 : i32
    return %c0_i32, %c0_i32_0 : i32, i32
  }
  func.func @transform_10(%arg0: i32) -> (i32, i32) {
    %c0_i32 = arith.constant 0 : i32
    %c0_i32_0 = arith.constant 0 : i32
    %c0_i32_1 = arith.constant 0 : i32
    return %c0_i32, %c0_i32_0 : i32, i32
  }
  func.func @transform_11(%arg0: i32) -> (i32, i32) {
    %c0_i32 = arith.constant 0 : i32
    %c0_i32_0 = arith.constant 0 : i32
    %c0_i32_1 = arith.constant 0 : i32
    return %c0_i32, %c0_i32_0 : i32, i32
  }
  func.func @transform_12(%arg0: i32) -> (i32, i32) {
    %c0_i32 = arith.constant 0 : i32
    %c0_i32_0 = arith.constant 0 : i32
    %c0_i32_1 = arith.constant 0 : i32
    return %c0_i32, %c0_i32_0 : i32, i32
  }
  func.func @transform_13(%arg0: i32) -> (i32, i32) {
    %c0_i32 = arith.constant 0 : i32
    %c0_i32_0 = arith.constant 0 : i32
    %c0_i32_1 = arith.constant 0 : i32
    return %c0_i32, %c0_i32_0 : i32, i32
  }
  func.func @transform_14(%arg0: i32) -> (i32, i32) {
    %c0_i32 = arith.constant 0 : i32
    %c0_i32_0 = arith.constant 0 : i32
    %c0_i32_1 = arith.constant 0 : i32
    return %c0_i32, %c0_i32_0 : i32, i32
  }
  func.func @transform_15(%arg0: i32) -> (i32, i32, i32) {
    %c0_i32 = arith.constant 0 : i32
    %c0_i32_0 = arith.constant 0 : i32
    %c0_i32_1 = arith.constant 0 : i32
    return %arg0, %c0_i32, %c0_i32_0 : i32, i32, i32
  }
}

module attributes {stable_mosaic.version = 11 : i64} {
  func.func @_layer_kernel(%arg0: i32, %arg1: memref<1x8x32xf32, #tpu.memory_space<vmem>>, %arg2: memref<1x8x8xf32, #tpu.memory_space<vmem>>, %arg3: memref<1x4x8x8xf32, #tpu.memory_space<vmem>>, %arg4: memref<8x64xf32, #tpu.memory_space<vmem>>, %arg5: memref<1x64xf32, #tpu.memory_space<vmem>>, %arg6: memref<32x96xf32, #tpu.memory_space<vmem>>, %arg7: memref<1x96xf32, #tpu.memory_space<vmem>>, %arg8: memref<32x32xf32, #tpu.memory_space<vmem>>, %arg9: memref<1x32xf32, #tpu.memory_space<vmem>>, %arg10: memref<8x64xf32, #tpu.memory_space<vmem>>, %arg11: memref<1x64xf32, #tpu.memory_space<vmem>>, %arg12: memref<32x128xf32, #tpu.memory_space<vmem>>, %arg13: memref<1x128xf32, #tpu.memory_space<vmem>>, %arg14: memref<128x32xf32, #tpu.memory_space<vmem>>, %arg15: memref<1x32xf32, #tpu.memory_space<vmem>>, %arg16: memref<1x8x32xf32, #tpu.memory_space<vmem>>) attributes {dimension_semantics = [#tpu.dimension_semantics<parallel>], iteration_bounds = array<i64: 2>, scalar_prefetch = 0 : i64, scratch_operands = 0 : i64, tpu.core_type = #tpu.core_type<tc>, window_params = [{transform_indices = @transform_0, window_bounds = array<i64: 1, 8, 32>}, {transform_indices = @transform_1, window_bounds = array<i64: 1, 8, 8>}, {transform_indices = @transform_2, window_bounds = array<i64: 1, 4, 8, 8>}, {pipeline_mode = #tpu.pipeline_mode<synchronous>, transform_indices = @transform_3, window_bounds = array<i64: 8, 64>}, {pipeline_mode = #tpu.pipeline_mode<synchronous>, transform_indices = @transform_4, window_bounds = array<i64: 1, 64>}, {pipeline_mode = #tpu.pipeline_mode<synchronous>, transform_indices = @transform_5, window_bounds = array<i64: 32, 96>}, {pipeline_mode = #tpu.pipeline_mode<synchronous>, transform_indices = @transform_6, window_bounds = array<i64: 1, 96>}, {pipeline_mode = #tpu.pipeline_mode<synchronous>, transform_indices = @transform_7, window_bounds = array<i64: 32, 32>}, {pipeline_mode = #tpu.pipeline_mode<synchronous>, transform_indices = @transform_8, window_bounds = array<i64: 1, 32>}, {pipeline_mode = #tpu.pipeline_mode<synchronous>, transform_indices = @transform_9, window_bounds = array<i64: 8, 64>}, {pipeline_mode = #tpu.pipeline_mode<synchronous>, transform_indices = @transform_10, window_bounds = array<i64: 1, 64>}, {pipeline_mode = #tpu.pipeline_mode<synchronous>, transform_indices = @transform_11, window_bounds = array<i64: 32, 128>}, {pipeline_mode = #tpu.pipeline_mode<synchronous>, transform_indices = @transform_12, window_bounds = array<i64: 1, 128>}, {pipeline_mode = #tpu.pipeline_mode<synchronous>, transform_indices = @transform_13, window_bounds = array<i64: 128, 32>}, {pipeline_mode = #tpu.pipeline_mode<synchronous>, transform_indices = @transform_14, window_bounds = array<i64: 1, 32>}, {transform_indices = @transform_15, window_bounds = array<i64: 1, 8, 32>}]} {
    %c0 = arith.constant 0 : index
    %c0_0 = arith.constant 0 : index
    %c0_1 = arith.constant 0 : index
    %0 = vector.load %arg1[%c0, %c0_0, %c0_1] : memref<1x8x32xf32, #tpu.memory_space<vmem>>, vector<1x8x32xf32>
    %1 = vector.shape_cast %0 : vector<1x8x32xf32> to vector<8x32xf32>
    %c0_2 = arith.constant 0 : index
    %c0_3 = arith.constant 0 : index
    %c0_4 = arith.constant 0 : index
    %2 = vector.load %arg2[%c0_2, %c0_3, %c0_4] : memref<1x8x8xf32, #tpu.memory_space<vmem>>, vector<1x8x8xf32>
    %3 = vector.shape_cast %2 : vector<1x8x8xf32> to vector<8x8xf32>
    %c0_5 = arith.constant 0 : index
    %c0_6 = arith.constant 0 : index
    %4 = vector.load %arg4[%c0_5, %c0_6] : memref<8x64xf32, #tpu.memory_space<vmem>>, vector<8x64xf32>
    %cst = arith.constant dense<0.000000e+00> : vector<8x64xf32>
    %5 = tpu.matmul %3, %4, %cst {dimension_numbers = #tpu.dot_dimension_numbers<[1], [0], [0], [1], [0, 0, 1, 1], [], []>} : vector<8x8xf32>, vector<8x64xf32>, vector<8x64xf32> -> vector<8x64xf32>
    %c0_7 = arith.constant 0 : index
    %c0_8 = arith.constant 0 : index
    %6 = vector.load %arg5[%c0_7, %c0_8] : memref<1x64xf32, #tpu.memory_space<vmem>>, vector<1x64xf32>
    %7 = vector.broadcast %6 : vector<1x64xf32> to vector<8x64xf32>
    %8 = arith.addf %5, %7 : vector<8x64xf32>
    %9 = vector.extract_strided_slice %8 {offsets = [0, 0], sizes = [8, 32], strides = [1, 1]} : vector<8x64xf32> to vector<8x32xf32>
    %10 = vector.extract_strided_slice %8 {offsets = [0, 32], sizes = [8, 32], strides = [1, 1]} : vector<8x64xf32> to vector<8x32xf32>
    %cst_9 = arith.constant dense<0.000000e+00> : vector<8xf32>
    %11 = vector.multi_reduction <add>, %1, %cst_9 [1] : vector<8x32xf32> to vector<8xf32>
    %12 = vector.shape_cast %11 : vector<8xf32> to vector<8x1xf32>
    %cst_10 = arith.constant 3.200000e+01 : f32
    %13 = vector.broadcast %cst_10 : f32 to vector<8x1xf32>
    %14 = arith.divf %12, %13 : vector<8x1xf32>
    %15 = vector.broadcast %14 : vector<8x1xf32> to vector<8x32xf32>
    %16 = arith.subf %1, %15 : vector<8x32xf32>
    %17 = arith.mulf %16, %16 : vector<8x32xf32>
    %cst_11 = arith.constant dense<0.000000e+00> : vector<8xf32>
    %18 = vector.multi_reduction <add>, %17, %cst_11 [1] : vector<8x32xf32> to vector<8xf32>
    %19 = vector.shape_cast %18 : vector<8xf32> to vector<8x1xf32>
    %cst_12 = arith.constant 3.200000e+01 : f32
    %20 = vector.broadcast %cst_12 : f32 to vector<8x1xf32>
    %21 = arith.divf %19, %20 : vector<8x1xf32>
    %22 = vector.broadcast %14 : vector<8x1xf32> to vector<8x32xf32>
    %23 = arith.subf %1, %22 : vector<8x32xf32>
    %cst_13 = arith.constant 9.99999974E-6 : f32
    %24 = vector.broadcast %cst_13 : f32 to vector<8x1xf32>
    %25 = arith.addf %21, %24 : vector<8x1xf32>
    %26 = math.rsqrt %25 : vector<8x1xf32>
    %27 = vector.broadcast %26 : vector<8x1xf32> to vector<8x32xf32>
    %28 = arith.mulf %23, %27 : vector<8x32xf32>
    %cst_14 = arith.constant 1.000000e+00 : f32
    %29 = vector.broadcast %cst_14 : f32 to vector<8x32xf32>
    %30 = arith.addf %29, %9 : vector<8x32xf32>
    %31 = arith.mulf %28, %30 : vector<8x32xf32>
    %32 = arith.addf %31, %10 : vector<8x32xf32>
    %c0_15 = arith.constant 0 : index
    %c0_16 = arith.constant 0 : index
    %33 = vector.load %arg6[%c0_15, %c0_16] : memref<32x96xf32, #tpu.memory_space<vmem>>, vector<32x96xf32>
    %cst_17 = arith.constant dense<0.000000e+00> : vector<8x96xf32>
    %34 = tpu.matmul %32, %33, %cst_17 {dimension_numbers = #tpu.dot_dimension_numbers<[1], [0], [0], [1], [0, 0, 1, 1], [], []>} : vector<8x32xf32>, vector<32x96xf32>, vector<8x96xf32> -> vector<8x96xf32>
    %c0_18 = arith.constant 0 : index
    %c0_19 = arith.constant 0 : index
    %35 = vector.load %arg7[%c0_18, %c0_19] : memref<1x96xf32, #tpu.memory_space<vmem>>, vector<1x96xf32>
    %36 = vector.broadcast %35 : vector<1x96xf32> to vector<8x96xf32>
    %37 = arith.addf %34, %36 : vector<8x96xf32>
    %38 = vector.extract_strided_slice %37 {offsets = [0, 0], sizes = [8, 32], strides = [1, 1]} : vector<8x96xf32> to vector<8x32xf32>
    %39 = vector.extract_strided_slice %37 {offsets = [0, 32], sizes = [8, 32], strides = [1, 1]} : vector<8x96xf32> to vector<8x32xf32>
    %40 = vector.extract_strided_slice %37 {offsets = [0, 64], sizes = [8, 32], strides = [1, 1]} : vector<8x96xf32> to vector<8x32xf32>
    %41 = vector.extract_strided_slice %38 {offsets = [0, 0], sizes = [8, 8], strides = [1, 1]} : vector<8x32xf32> to vector<8x8xf32>
    %42 = vector.extract_strided_slice %38 {offsets = [0, 8], sizes = [8, 8], strides = [1, 1]} : vector<8x32xf32> to vector<8x8xf32>
    %43 = vector.extract_strided_slice %38 {offsets = [0, 16], sizes = [8, 8], strides = [1, 1]} : vector<8x32xf32> to vector<8x8xf32>
    %44 = vector.extract_strided_slice %38 {offsets = [0, 24], sizes = [8, 8], strides = [1, 1]} : vector<8x32xf32> to vector<8x8xf32>
    %45 = vector.shape_cast %41 : vector<8x8xf32> to vector<1x8x8xf32>
    %46 = vector.shape_cast %42 : vector<8x8xf32> to vector<1x8x8xf32>
    %47 = vector.shape_cast %43 : vector<8x8xf32> to vector<1x8x8xf32>
    %48 = vector.shape_cast %44 : vector<8x8xf32> to vector<1x8x8xf32>
    %49 = tpu.concatenate %45, %46, %47, %48 in 0 : vector<1x8x8xf32>, vector<1x8x8xf32>, vector<1x8x8xf32>, vector<1x8x8xf32> -> vector<4x8x8xf32>
    %50 = vector.extract_strided_slice %39 {offsets = [0, 0], sizes = [8, 8], strides = [1, 1]} : vector<8x32xf32> to vector<8x8xf32>
    %51 = vector.extract_strided_slice %39 {offsets = [0, 8], sizes = [8, 8], strides = [1, 1]} : vector<8x32xf32> to vector<8x8xf32>
    %52 = vector.extract_strided_slice %39 {offsets = [0, 16], sizes = [8, 8], strides = [1, 1]} : vector<8x32xf32> to vector<8x8xf32>
    %53 = vector.extract_strided_slice %39 {offsets = [0, 24], sizes = [8, 8], strides = [1, 1]} : vector<8x32xf32> to vector<8x8xf32>
    %54 = vector.shape_cast %50 : vector<8x8xf32> to vector<1x8x8xf32>
    %55 = vector.shape_cast %51 : vector<8x8xf32> to vector<1x8x8xf32>
    %56 = vector.shape_cast %52 : vector<8x8xf32> to vector<1x8x8xf32>
    %57 = vector.shape_cast %53 : vector<8x8xf32> to vector<1x8x8xf32>
    %58 = tpu.concatenate %54, %55, %56, %57 in 0 : vector<1x8x8xf32>, vector<1x8x8xf32>, vector<1x8x8xf32>, vector<1x8x8xf32> -> vector<4x8x8xf32>
    %59 = vector.extract_strided_slice %40 {offsets = [0, 0], sizes = [8, 8], strides = [1, 1]} : vector<8x32xf32> to vector<8x8xf32>
    %60 = vector.extract_strided_slice %40 {offsets = [0, 8], sizes = [8, 8], strides = [1, 1]} : vector<8x32xf32> to vector<8x8xf32>
    %61 = vector.extract_strided_slice %40 {offsets = [0, 16], sizes = [8, 8], strides = [1, 1]} : vector<8x32xf32> to vector<8x8xf32>
    %62 = vector.extract_strided_slice %40 {offsets = [0, 24], sizes = [8, 8], strides = [1, 1]} : vector<8x32xf32> to vector<8x8xf32>
    %63 = vector.shape_cast %59 : vector<8x8xf32> to vector<1x8x8xf32>
    %64 = vector.shape_cast %60 : vector<8x8xf32> to vector<1x8x8xf32>
    %65 = vector.shape_cast %61 : vector<8x8xf32> to vector<1x8x8xf32>
    %66 = vector.shape_cast %62 : vector<8x8xf32> to vector<1x8x8xf32>
    %67 = tpu.concatenate %63, %64, %65, %66 in 0 : vector<1x8x8xf32>, vector<1x8x8xf32>, vector<1x8x8xf32>, vector<1x8x8xf32> -> vector<4x8x8xf32>
    "tpu.trace_start"() <{level = 10 : i32, message = "hqd,hkd->hqk"}> : () -> ()
    %cst_20 = arith.constant dense<0.000000e+00> : vector<4x8x8xf32>
    %68 = tpu.matmul %49, %58, %cst_20 {dimension_numbers = #tpu.dot_dimension_numbers<[2], [2], [1], [1], [0, 0, 0, 1, 1, 1], [0], [0]>} : vector<4x8x8xf32>, vector<4x8x8xf32>, vector<4x8x8xf32> -> vector<4x8x8xf32>
    "tpu.trace_stop"() : () -> ()
    %c0_21 = arith.constant 0 : index
    %c0_22 = arith.constant 0 : index
    %c0_23 = arith.constant 0 : index
    %c0_24 = arith.constant 0 : index
    %69 = vector.load %arg3[%c0_21, %c0_22, %c0_23, %c0_24] : memref<1x4x8x8xf32, #tpu.memory_space<vmem>>, vector<1x4x8x8xf32>
    %70 = vector.shape_cast %69 : vector<1x4x8x8xf32> to vector<4x8x8xf32>
    %71 = arith.addf %68, %70 : vector<4x8x8xf32>
    %cst_25 = arith.constant dense<0xFF800000> : vector<4x8xf32>
    %72 = vector.multi_reduction <maximumf>, %71, %cst_25 [2] : vector<4x8x8xf32> to vector<4x8xf32>
    %73 = vector.shape_cast %72 : vector<4x8xf32> to vector<4x8x1xf32>
    %74 = vector.broadcast %73 : vector<4x8x1xf32> to vector<4x8x8xf32>
    %75 = arith.subf %71, %74 : vector<4x8x8xf32>
    %76 = math.exp %75 : vector<4x8x8xf32>
    %cst_26 = arith.constant dense<0.000000e+00> : vector<4x8xf32>
    %77 = vector.multi_reduction <add>, %76, %cst_26 [2] : vector<4x8x8xf32> to vector<4x8xf32>
    %78 = vector.shape_cast %77 : vector<4x8xf32> to vector<4x8x1xf32>
    %79 = tpu.reciprocal %78 {approx = true} : vector<4x8x1xf32> -> vector<4x8x1xf32>
    %80 = vector.broadcast %79 : vector<4x8x1xf32> to vector<4x8x8xf32>
    %81 = arith.mulf %76, %80 : vector<4x8x8xf32>
    "tpu.trace_start"() <{level = 10 : i32, message = "hqk,hkd->hqd"}> : () -> ()
    %cst_27 = arith.constant dense<0.000000e+00> : vector<4x8x8xf32>
    %82 = tpu.matmul %81, %67, %cst_27 {dimension_numbers = #tpu.dot_dimension_numbers<[2], [1], [1], [2], [0, 0, 0, 1, 1, 2], [0], [0]>} : vector<4x8x8xf32>, vector<4x8x8xf32>, vector<4x8x8xf32> -> vector<4x8x8xf32>
    "tpu.trace_stop"() : () -> ()
    %83 = vector.extract_strided_slice %82 {offsets = [0, 0, 0], sizes = [1, 8, 8], strides = [1, 1, 1]} : vector<4x8x8xf32> to vector<1x8x8xf32>
    %84 = vector.shape_cast %83 : vector<1x8x8xf32> to vector<8x8xf32>
    %85 = vector.extract_strided_slice %82 {offsets = [1, 0, 0], sizes = [1, 8, 8], strides = [1, 1, 1]} : vector<4x8x8xf32> to vector<1x8x8xf32>
    %86 = vector.shape_cast %85 : vector<1x8x8xf32> to vector<8x8xf32>
    %87 = vector.extract_strided_slice %82 {offsets = [2, 0, 0], sizes = [1, 8, 8], strides = [1, 1, 1]} : vector<4x8x8xf32> to vector<1x8x8xf32>
    %88 = vector.shape_cast %87 : vector<1x8x8xf32> to vector<8x8xf32>
    %89 = vector.extract_strided_slice %82 {offsets = [3, 0, 0], sizes = [1, 8, 8], strides = [1, 1, 1]} : vector<4x8x8xf32> to vector<1x8x8xf32>
    %90 = vector.shape_cast %89 : vector<1x8x8xf32> to vector<8x8xf32>
    %91 = tpu.concatenate %84, %86, %88, %90 in 1 : vector<8x8xf32>, vector<8x8xf32>, vector<8x8xf32>, vector<8x8xf32> -> vector<8x32xf32>
    %c0_28 = arith.constant 0 : index
    %c0_29 = arith.constant 0 : index
    %92 = vector.load %arg8[%c0_28, %c0_29] : memref<32x32xf32, #tpu.memory_space<vmem>>, vector<32x32xf32>
    %cst_30 = arith.constant dense<0.000000e+00> : vector<8x32xf32>
    %93 = tpu.matmul %91, %92, %cst_30 {dimension_numbers = #tpu.dot_dimension_numbers<[1], [0], [0], [1], [0, 0, 1, 1], [], []>} : vector<8x32xf32>, vector<32x32xf32>, vector<8x32xf32> -> vector<8x32xf32>
    %94 = arith.addf %1, %93 : vector<8x32xf32>
    %c0_31 = arith.constant 0 : index
    %c0_32 = arith.constant 0 : index
    %95 = vector.load %arg9[%c0_31, %c0_32] : memref<1x32xf32, #tpu.memory_space<vmem>>, vector<1x32xf32>
    %96 = vector.broadcast %95 : vector<1x32xf32> to vector<8x32xf32>
    %97 = arith.addf %94, %96 : vector<8x32xf32>
    %c0_33 = arith.constant 0 : index
    %c0_34 = arith.constant 0 : index
    %98 = vector.load %arg10[%c0_33, %c0_34] : memref<8x64xf32, #tpu.memory_space<vmem>>, vector<8x64xf32>
    %cst_35 = arith.constant dense<0.000000e+00> : vector<8x64xf32>
    %99 = tpu.matmul %3, %98, %cst_35 {dimension_numbers = #tpu.dot_dimension_numbers<[1], [0], [0], [1], [0, 0, 1, 1], [], []>} : vector<8x8xf32>, vector<8x64xf32>, vector<8x64xf32> -> vector<8x64xf32>
    %c0_36 = arith.constant 0 : index
    %c0_37 = arith.constant 0 : index
    %100 = vector.load %arg11[%c0_36, %c0_37] : memref<1x64xf32, #tpu.memory_space<vmem>>, vector<1x64xf32>
    %101 = vector.broadcast %100 : vector<1x64xf32> to vector<8x64xf32>
    %102 = arith.addf %99, %101 : vector<8x64xf32>
    %103 = vector.extract_strided_slice %102 {offsets = [0, 0], sizes = [8, 32], strides = [1, 1]} : vector<8x64xf32> to vector<8x32xf32>
    %104 = vector.extract_strided_slice %102 {offsets = [0, 32], sizes = [8, 32], strides = [1, 1]} : vector<8x64xf32> to vector<8x32xf32>
    %cst_38 = arith.constant dense<0.000000e+00> : vector<8xf32>
    %105 = vector.multi_reduction <add>, %97, %cst_38 [1] : vector<8x32xf32> to vector<8xf32>
    %106 = vector.shape_cast %105 : vector<8xf32> to vector<8x1xf32>
    %cst_39 = arith.constant 3.200000e+01 : f32
    %107 = vector.broadcast %cst_39 : f32 to vector<8x1xf32>
    %108 = arith.divf %106, %107 : vector<8x1xf32>
    %109 = vector.broadcast %108 : vector<8x1xf32> to vector<8x32xf32>
    %110 = arith.subf %97, %109 : vector<8x32xf32>
    %111 = arith.mulf %110, %110 : vector<8x32xf32>
    %cst_40 = arith.constant dense<0.000000e+00> : vector<8xf32>
    %112 = vector.multi_reduction <add>, %111, %cst_40 [1] : vector<8x32xf32> to vector<8xf32>
    %113 = vector.shape_cast %112 : vector<8xf32> to vector<8x1xf32>
    %cst_41 = arith.constant 3.200000e+01 : f32
    %114 = vector.broadcast %cst_41 : f32 to vector<8x1xf32>
    %115 = arith.divf %113, %114 : vector<8x1xf32>
    %116 = vector.broadcast %108 : vector<8x1xf32> to vector<8x32xf32>
    %117 = arith.subf %97, %116 : vector<8x32xf32>
    %cst_42 = arith.constant 9.99999974E-6 : f32
    %118 = vector.broadcast %cst_42 : f32 to vector<8x1xf32>
    %119 = arith.addf %115, %118 : vector<8x1xf32>
    %120 = math.rsqrt %119 : vector<8x1xf32>
    %121 = vector.broadcast %120 : vector<8x1xf32> to vector<8x32xf32>
    %122 = arith.mulf %117, %121 : vector<8x32xf32>
    %cst_43 = arith.constant 1.000000e+00 : f32
    %123 = vector.broadcast %cst_43 : f32 to vector<8x32xf32>
    %124 = arith.addf %123, %103 : vector<8x32xf32>
    %125 = arith.mulf %122, %124 : vector<8x32xf32>
    %126 = arith.addf %125, %104 : vector<8x32xf32>
    %c0_44 = arith.constant 0 : index
    %c0_45 = arith.constant 0 : index
    %127 = vector.load %arg12[%c0_44, %c0_45] : memref<32x128xf32, #tpu.memory_space<vmem>>, vector<32x128xf32>
    %cst_46 = arith.constant dense<0.000000e+00> : vector<8x128xf32>
    %128 = tpu.matmul %126, %127, %cst_46 {dimension_numbers = #tpu.dot_dimension_numbers<[1], [0], [0], [1], [0, 0, 1, 1], [], []>} : vector<8x32xf32>, vector<32x128xf32>, vector<8x128xf32> -> vector<8x128xf32>
    %c0_47 = arith.constant 0 : index
    %c0_48 = arith.constant 0 : index
    %129 = vector.load %arg13[%c0_47, %c0_48] : memref<1x128xf32, #tpu.memory_space<vmem>>, vector<1x128xf32>
    %130 = vector.broadcast %129 : vector<1x128xf32> to vector<8x128xf32>
    %131 = arith.addf %128, %130 : vector<8x128xf32>
    %cst_49 = arith.constant 0.000000e+00 : f32
    %132 = vector.broadcast %cst_49 : f32 to vector<8x128xf32>
    %133 = arith.maximumf %131, %132 : vector<8x128xf32>
    %c0_50 = arith.constant 0 : index
    %c0_51 = arith.constant 0 : index
    %134 = vector.load %arg14[%c0_50, %c0_51] : memref<128x32xf32, #tpu.memory_space<vmem>>, vector<128x32xf32>
    %cst_52 = arith.constant dense<0.000000e+00> : vector<8x32xf32>
    %135 = tpu.matmul %133, %134, %cst_52 {dimension_numbers = #tpu.dot_dimension_numbers<[1], [0], [0], [1], [0, 0, 1, 1], [], []>} : vector<8x128xf32>, vector<128x32xf32>, vector<8x32xf32> -> vector<8x32xf32>
    %136 = arith.addf %97, %135 : vector<8x32xf32>
    %c0_53 = arith.constant 0 : index
    %c0_54 = arith.constant 0 : index
    %137 = vector.load %arg15[%c0_53, %c0_54] : memref<1x32xf32, #tpu.memory_space<vmem>>, vector<1x32xf32>
    %138 = vector.broadcast %137 : vector<1x32xf32> to vector<8x32xf32>
    %139 = arith.addf %136, %138 : vector<8x32xf32>
    %c0_55 = arith.constant 0 : index
    %c0_56 = arith.constant 0 : index
    %c0_57 = arith.constant 0 : index
    %140 = vector.load %arg16[%c0_55, %c0_56, %c0_57] : memref<1x8x32xf32, #tpu.memory_space<vmem>>, vector<1x8x32xf32>
    %141 = vector.shape_cast %140 : vector<1x8x32xf32> to vector<8x32xf32>
    %142 = vector.shape_cast %139 : vector<8x32xf32> to vector<1x8x32xf32>
    tpu.vector_store %arg16[%c0_55, %c0_56, %c0_57], %142 {strides = array<i32>} : memref<1x8x32xf32, #tpu.memory_space<vmem>>, vector<1x8x32xf32>,
    return
  }
  func.func @transform_0(%arg0: i32) -> (i32, i32, i32) {
    %c0_i32 = arith.constant 0 : i32
    %c0_i32_0 = arith.constant 0 : i32
    %c0_i32_1 = arith.constant 0 : i32
    return %arg0, %c0_i32, %c0_i32_0 : i32, i32, i32
  }
  func.func @transform_1(%arg0: i32) -> (i32, i32, i32) {
    %c0_i32 = arith.constant 0 : i32
    %c0_i32_0 = arith.constant 0 : i32
    %c0_i32_1 = arith.constant 0 : i32
    return %arg0, %c0_i32, %c0_i32_0 : i32, i32, i32
  }
  func.func @transform_2(%arg0: i32) -> (i32, i32, i32, i32) {
    %c1_i32 = arith.constant 1 : i32
    %c0_i32 = arith.constant 0 : i32
    %c0_i32_0 = arith.constant 0 : i32
    %c0_i32_1 = arith.constant 0 : i32
    %c0_i32_2 = arith.constant 0 : i32
    return %c1_i32, %c0_i32, %c0_i32_0, %c0_i32_1 : i32, i32, i32, i32
  }
  func.func @transform_3(%arg0: i32) -> (i32, i32) {
    %c0_i32 = arith.constant 0 : i32
    %c0_i32_0 = arith.constant 0 : i32
    %c0_i32_1 = arith.constant 0 : i32
    return %c0_i32, %c0_i32_0 : i32, i32
  }
  func.func @transform_4(%arg0: i32) -> (i32, i32) {
    %c0_i32 = arith.constant 0 : i32
    %c0_i32_0 = arith.constant 0 : i32
    %c0_i32_1 = arith.constant 0 : i32
    return %c0_i32, %c0_i32_0 : i32, i32
  }
  func.func @transform_5(%arg0: i32) -> (i32, i32) {
    %c0_i32 = arith.constant 0 : i32
    %c0_i32_0 = arith.constant 0 : i32
    %c0_i32_1 = arith.constant 0 : i32
    return %c0_i32, %c0_i32_0 : i32, i32
  }
  func.func @transform_6(%arg0: i32) -> (i32, i32) {
    %c0_i32 = arith.constant 0 : i32
    %c0_i32_0 = arith.constant 0 : i32
    %c0_i32_1 = arith.constant 0 : i32
    return %c0_i32, %c0_i32_0 : i32, i32
  }
  func.func @transform_7(%arg0: i32) -> (i32, i32) {
    %c0_i32 = arith.constant 0 : i32
    %c0_i32_0 = arith.constant 0 : i32
    %c0_i32_1 = arith.constant 0 : i32
    return %c0_i32, %c0_i32_0 : i32, i32
  }
  func.func @transform_8(%arg0: i32) -> (i32, i32) {
    %c0_i32 = arith.constant 0 : i32
    %c0_i32_0 = arith.constant 0 : i32
    %c0_i32_1 = arith.constant 0 : i32
    return %c0_i32, %c0_i32_0 : i32, i32
  }
  func.func @transform_9(%arg0: i32) -> (i32, i32) {
    %c0_i32 = arith.constant 0 : i32
    %c0_i32_0 = arith.constant 0 : i32
    %c0_i32_1 = arith.constant 0 : i32
    return %c0_i32, %c0_i32_0 : i32, i32
  }
  func.func @transform_10(%arg0: i32) -> (i32, i32) {
    %c0_i32 = arith.constant 0 : i32
    %c0_i32_0 = arith.constant 0 : i32
    %c0_i32_1 = arith.constant 0 : i32
    return %c0_i32, %c0_i32_0 : i32, i32
  }
  func.func @transform_11(%arg0: i32) -> (i32, i32) {
    %c0_i32 = arith.constant 0 : i32
    %c0_i32_0 = arith.constant 0 : i32
    %c0_i32_1 = arith.constant 0 : i32
    return %c0_i32, %c0_i32_0 : i32, i32
  }
  func.func @transform_12(%arg0: i32) -> (i32, i32) {
    %c0_i32 = arith.constant 0 : i32
    %c0_i32_0 = arith.constant 0 : i32
    %c0_i32_1 = arith.constant 0 : i32
    return %c0_i32, %c0_i32_0 : i32, i32
  }
  func.func @transform_13(%arg0: i32) -> (i32, i32) {
    %c0_i32 = arith.constant 0 : i32
    %c0_i32_0 = arith.constant 0 : i32
    %c0_i32_1 = arith.constant 0 : i32
    return %c0_i32, %c0_i32_0 : i32, i32
  }
  func.func @transform_14(%arg0: i32) -> (i32, i32) {
    %c0_i32 = arith.constant 0 : i32
    %c0_i32_0 = arith.constant 0 : i32
    %c0_i32_1 = arith.constant 0 : i32
    return %c0_i32, %c0_i32_0 : i32, i32
  }
  func.func @transform_15(%arg0: i32) -> (i32, i32, i32) {
    %c0_i32 = arith.constant 0 : i32
    %c0_i32_0 = arith.constant 0 : i32
    %c0_i32_1 = arith.constant 0 : i32
    return %arg0, %c0_i32, %c0_i32_0 : i32, i32, i32
  }
}

module attributes {stable_mosaic.version = 11 : i64} {
  func.func @_mlp2_kernel(%arg0: i32, %arg1: memref<16x32xf32, #tpu.memory_space<vmem>>, %arg2: memref<32x32xf32, #tpu.memory_space<vmem>>, %arg3: memref<1x32xf32, #tpu.memory_space<vmem>>, %arg4: memref<32x3xf32, #tpu.memory_space<vmem>>, %arg5: memref<1x3xf32, #tpu.memory_space<vmem>>, %arg6: memref<16x3xf32, #tpu.memory_space<vmem>>) attributes {dimension_semantics = [#tpu.dimension_semantics<parallel>], iteration_bounds = array<i64: 1>, scalar_prefetch = 0 : i64, scratch_operands = 0 : i64, tpu.core_type = #tpu.core_type<tc>, window_params = [{transform_indices = @transform_0, window_bounds = array<i64: 16, 32>}, {pipeline_mode = #tpu.pipeline_mode<synchronous>, transform_indices = @transform_1, window_bounds = array<i64: 32, 32>}, {pipeline_mode = #tpu.pipeline_mode<synchronous>, transform_indices = @transform_2, window_bounds = array<i64: 1, 32>}, {pipeline_mode = #tpu.pipeline_mode<synchronous>, transform_indices = @transform_3, window_bounds = array<i64: 32, 3>}, {pipeline_mode = #tpu.pipeline_mode<synchronous>, transform_indices = @transform_4, window_bounds = array<i64: 1, 3>}, {transform_indices = @transform_5, window_bounds = array<i64: 16, 3>}]} {
    %c0 = arith.constant 0 : index
    %c0_0 = arith.constant 0 : index
    %0 = vector.load %arg1[%c0, %c0_0] : memref<16x32xf32, #tpu.memory_space<vmem>>, vector<16x32xf32>
    %c0_1 = arith.constant 0 : index
    %c0_2 = arith.constant 0 : index
    %1 = vector.load %arg2[%c0_1, %c0_2] : memref<32x32xf32, #tpu.memory_space<vmem>>, vector<32x32xf32>
    %cst = arith.constant dense<0.000000e+00> : vector<16x32xf32>
    %2 = tpu.matmul %0, %1, %cst {dimension_numbers = #tpu.dot_dimension_numbers<[1], [0], [0], [1], [0, 0, 1, 1], [], []>} : vector<16x32xf32>, vector<32x32xf32>, vector<16x32xf32> -> vector<16x32xf32>
    %c0_3 = arith.constant 0 : index
    %c0_4 = arith.constant 0 : index
    %3 = vector.load %arg3[%c0_3, %c0_4] : memref<1x32xf32, #tpu.memory_space<vmem>>, vector<1x32xf32>
    %4 = vector.broadcast %3 : vector<1x32xf32> to vector<16x32xf32>
    %5 = arith.addf %2, %4 : vector<16x32xf32>
    %cst_5 = arith.constant 0.000000e+00 : f32
    %6 = vector.broadcast %cst_5 : f32 to vector<16x32xf32>
    %7 = arith.maximumf %5, %6 : vector<16x32xf32>
    %c0_6 = arith.constant 0 : index
    %c0_7 = arith.constant 0 : index
    %8 = vector.load %arg4[%c0_6, %c0_7] : memref<32x3xf32, #tpu.memory_space<vmem>>, vector<32x3xf32>
    %cst_8 = arith.constant dense<0.000000e+00> : vector<16x3xf32>
    %9 = tpu.matmul %7, %8, %cst_8 {dimension_numbers = #tpu.dot_dimension_numbers<[1], [0], [0], [1], [0, 0, 1, 1], [], []>} : vector<16x32xf32>, vector<32x3xf32>, vector<16x3xf32> -> vector<16x3xf32>
    %c0_9 = arith.constant 0 : index
    %c0_10 = arith.constant 0 : index
    %10 = vector.load %arg5[%c0_9, %c0_10] : memref<1x3xf32, #tpu.memory_space<vmem>>, vector<1x3xf32>
    %11 = vector.broadcast %10 : vector<1x3xf32> to vector<16x3xf32>
    %12 = arith.addf %9, %11 : vector<16x3xf32>
    %c0_11 = arith.constant 0 : index
    %c0_12 = arith.constant 0 : index
    %13 = vector.load %arg6[%c0_11, %c0_12] : memref<16x3xf32, #tpu.memory_space<vmem>>, vector<16x3xf32>
    tpu.vector_store %arg6[%c0_11, %c0_12], %12 {strides = array<i32>} : memref<16x3xf32, #tpu.memory_space<vmem>>, vector<16x3xf32>,
    return
  }
  func.func @transform_0(%arg0: i32) -> (i32, i32) {
    %c0_i32 = arith.constant 0 : i32
    %c0_i32_0 = arith.constant 0 : i32
    return %arg0, %c0_i32 : i32, i32
  }
  func.func @transform_1(%arg0: i32) -> (i32, i32) {
    %c0_i32 = arith.constant 0 : i32
    %c0_i32_0 = arith.constant 0 : i32
    %c0_i32_1 = arith.constant 0 : i32
    return %c0_i32, %c0_i32_0 : i32, i32
  }
  func.func @transform_2(%arg0: i32) -> (i32, i32) {
    %c0_i32 = arith.constant 0 : i32
    %c0_i32_0 = arith.constant 0 : i32
    %c0_i32_1 = arith.constant 0 : i32
    return %c0_i32, %c0_i32_0 : i32, i32
  }
  func.func @transform_3(%arg0: i32) -> (i32, i32) {
    %c0_i32 = arith.constant 0 : i32
    %c0_i32_0 = arith.constant 0 : i32
    %c0_i32_1 = arith.constant 0 : i32
    return %c0_i32, %c0_i32_0 : i32, i32
  }
  func.func @transform_4(%arg0: i32) -> (i32, i32) {
    %c0_i32 = arith.constant 0 : i32
    %c0_i32_0 = arith.constant 0 : i32
    %c0_i32_1 = arith.constant 0 : i32
    return %c0_i32, %c0_i32_0 : i32, i32
  }
  func.func @transform_5(%arg0: i32) -> (i32, i32) {
    %c0_i32 = arith.constant 0 : i32
    %c0_i32_0 = arith.constant 0 : i32
    return %arg0, %c0_i32 : i32, i32
  }
}

</mosaic_0001>

<bundles_post_ra>
// kernel: _lambda_.5
= control target key start
LH: loop header
LB: loop body
LE: loop exit
PB: predicated region body
PF: predicated region fallthrough
CT: control target
= control target key end

     0   :  { %vm25_vm0 = vcmask 130048   ;;  %vm107_vm1 = vcmask 261120   ;;  %s173_s1 = inlined_call_operand.vmem [shape: f32[16,32], index: 1, kind: input, shape index: {}]   ;;  %s174_s0 = inlined_call_operand.vmem [shape: f32[16,16], index: 0, kind: input, shape index: {}]   ;;  %s175_s2 = inlined_call_operand.vmem [shape: f32[1,32], index: 2, kind: input, shape index: {}]   ;;  %s176_s3 = inlined_call_operand.vmem [shape: f32[16,32], index: 3, kind: output, shape index: {}]  }
   0x1   :  { %v16_v0 = vld [vmem:[%s173_s1] sm:$0xff]  ;;  %v17_v1 = vld [vmem:[%s173_s1 + $0x8] sm:$0xff] }
   0x2   :  { %v14_v2 = vld [vmem:[%s174_s0] sm:$0xff]  ;;  %v128_v3 = vpack.c.bf16 %v17_v1, %v16_v0  ;;  %v15_v4 = vld [vmem:[%s174_s0 + $0x8] sm:$0xff] }
   0x3   :  { %125 = vmatprep.mubr.msk.f32.mxu0 %vm25_vm0, %v14_v2  ;;  %v114_v5 = vld [vmem:[%s175_s2] ss:$0 sm:$0xff] }
   0x4   :  { %129 = vmatprep.subr.bf16.mxu0 %v128_v3 }
   0x5   :  { %131 = vmatpush3.bf16.msra.mxu0 %v128_v3 }
   0x8   :  { %126 = vmatmul.mubr.msk.f32.vlgmr.msra.gmra.mrb[0].mxu0 %vm25_vm0, %v15_v4 }
  0xdb   :  { %v127_v6 = vpop.f32.mrb[0].mxu0 }
  0xdc   :  { %v104_v7 = vadd.f32 %v127_v6, %v114_v5  ;;  %v98_v8 = vpop.f32.mrb[1].mxu0 }
  0xdd   :  { %v99_v9 = vadd.f32 %v114_v5, %v98_v8 }
  0xde   :  { %109 = vst.msk [vmem:[%s176_s3 + $0x8] sm:$0xff] %vm107_vm1, %v104_v7 }
  0xdf   :  { %108 = vst.msk [vmem:[%s176_s3] sm:$0xff] %vm107_vm1, %v99_v9 }

// kernel: _lambda_.6
= control target key start
LH: loop header
LB: loop body
LE: loop exit
PB: predicated region body
PF: predicated region fallthrough
CT: control target
= control target key end

     0   :  { %vm62_vm0 = vcmask 1040384   ;;  %vm37_vm1 = vcmask 72704   ;;  %vm405_vm2 = vmmov 1   ;;  %vm180_vm4 = vcmask 130048   ;;  %s526_s1 = inlined_call_operand.vmem [shape: f32[9,16], index: 1, kind: input, shape index: {}]   ;;  %s527_s0 = inlined_call_operand.vmem [shape: f32[64,9], index: 0, kind: input, shape index: {}]   ;;  %s528_s3 = inlined_call_operand.vmem [shape: f32[16,8], index: 3, kind: input, shape index: {}]   ;;  %s529_s2 = inlined_call_operand.vmem [shape: f32[1,16], index: 2, kind: input, shape index: {}]   ;;  %s530_s4 = inlined_call_operand.vmem [shape: f32[1,8], index: 4, kind: input, shape index: {}]   ;;  %s531_s5 = inlined_call_operand.vmem [shape: f32[64,8], index: 5, kind: output, shape index: {}]  }
   0x1   :  { %v28_v0 = vld [vmem:[%s526_s1] sm:$0xff]  ;;  %v29_v1 = vld [vmem:[%s526_s1 + $0x8] sm:$0x1]  ;;  %vm395_vm3 = vmpackc.low %vm62_vm0, %vm405_vm2  ;;  %vm310_vm5 = vcmask 64512  }
   0x2   :  { %v394_v2 = vpack.c.bf16 %v29_v1, %v28_v0  ;;  %v20_v3 = vld [vmem:[%s527_s0] sm:$0xff]  ;;  %v21_v4 = vld [vmem:[%s527_s0 + $0x8] sm:$0xff]  ;;  %v22_v5 = vld [vmem:[%s527_s0 + $0x10] sm:$0xff] }
   0x3   :  { %366 = vmatprep.mubr.msk.f32.mxu0 %vm37_vm1, %v20_v3  ;;  %v23_v6 = vld [vmem:[%s527_s0 + $0x18] sm:$0xff]  ;;  %v24_v7 = vld [vmem:[%s527_s0 + $0x20] sm:$0xff]  ;;  %v25_v8 = vld [vmem:[%s527_s0 + $0x28] sm:$0xff] }
   0x4   :  { %396 = vmatprep.subr.msk.bf16.mxu0 %vm395_vm3, %v394_v2  ;;  %v26_v9 = vld [vmem:[%s527_s0 + $0x30] sm:$0xff]  ;;  %v27_v10 = vld [vmem:[%s527_s0 + $0x38] sm:$0xff]  ;;  %v171_v11 = vld [vmem:[%s528_s3] sm:$0xff] }
   0x5   :  { %399 = vmatpush3.bf16.msk.msra.mxu0 %vm395_vm3, %v394_v2  ;;  %v172_v12 = vld [vmem:[%s528_s3 + $0x8] sm:$0xff]  ;;  %v323_v14 = vld [vmem:[%s529_s2] ss:$0 sm:$0xff] }
   0x6   :  { %v400_v13 = vpack.c.bf16 %v172_v12, %v171_v11  ;;  %v333_v31 = vld [vmem:[%s530_s4] ss:$0 sm:$0xff] }
   0x8   :  { %367 = vmatmul.mubr.msk.f32.vlgmr.msra.gmra.mrb[0].mxu0 %vm37_vm1, %v21_v4  ;;  %401 = vmatprep.subr.bf16.mxu1 %v400_v13 }
   0x9   :  { %369 = vmatprep.mubr.msk.f32.mxu0 %vm37_vm1, %v22_v5  ;;  %403 = vmatpush3.bf16.msra.mxu1 %v400_v13 }
   0xc   :  { %370 = vmatmul.mubr.msk.f32.gmra.mrb[2].mxu0 %vm37_vm1, %v23_v6 }
   0xd   :  { %372 = vmatprep.mubr.msk.f32.mxu0 %vm37_vm1, %v24_v7 }
  0x10   :  { %373 = vmatmul.mubr.msk.f32.gmra.mrb[4].mxu0 %vm37_vm1, %v25_v8 }
  0x11   :  { %375 = vmatprep.mubr.msk.f32.mxu0 %vm37_vm1, %v26_v9 }
  0x14   :  { %376 = vmatmul.mubr.msk.f32.gmra.mrb[6].mxu0 %vm37_vm1, %v27_v10 }
  0xdb   :  { %v368_v15 = vpop.f32.mrb[0].mxu0 }
  0xdc   :  { %v132_v16 = vpop.f32.mrb[1].mxu0  ;;  %v138_v18 = vadd.f32 %v368_v15, %v323_v14 }
  0xdd   :  { %v133_v17 = vadd.f32 %v323_v14, %v132_v16 }
  0xdf   :  { %v371_v19 = vpop.f32.mrb[2].mxu0  ;;  %382 = vmatprep.mubr.msk.f32.mxu1 %vm180_vm4, %v133_v17 }
  0xe0   :  { %v142_v20 = vpop.f32.mrb[3].mxu0  ;;  %383 = vmatmul.mubr.msk.f32.vlgmr.msra.gmra.mrb[0].mxu1 %vm180_vm4, %v138_v18  ;;  %v148_v22 = vadd.f32 %v371_v19, %v323_v14 }
  0xe1   :  { %v143_v21 = vadd.f32 %v323_v14, %v142_v20 }
  0xe3   :  { %v374_v23 = vpop.f32.mrb[4].mxu0  ;;  %385 = vmatprep.mubr.msk.f32.mxu1 %vm180_vm4, %v143_v21 }
  0xe4   :  { %v152_v24 = vpop.f32.mrb[5].mxu0  ;;  %386 = vmatmul.mubr.msk.f32.gmra.mrb[2].mxu1 %vm180_vm4, %v148_v22  ;;  %v158_v26 = vadd.f32 %v374_v23, %v323_v14 }
  0xe5   :  { %v153_v25 = vadd.f32 %v323_v14, %v152_v24 }
  0xe7   :  { %v377_v27 = vpop.f32.mrb[6].mxu0  ;;  %388 = vmatprep.mubr.msk.f32.mxu1 %vm180_vm4, %v153_v25 }
  0xe8   :  { %v162_v28 = vpop.f32.mrb[7].mxu0  ;;  %389 = vmatmul.mubr.msk.f32.gmra.mrb[4].mxu1 %vm180_vm4, %v158_v26  ;;  %v168_v30 = vadd.f32 %v377_v27, %v323_v14 }
  0xe9   :  { %v163_v29 = vadd.f32 %v323_v14, %v162_v28 }
  0xeb   :  { %391 = vmatprep.mubr.msk.f32.mxu1 %vm180_vm4, %v163_v29 }
  0xec   :  { %392 = vmatmul.mubr.msk.f32.gmra.mrb[6].mxu1 %vm180_vm4, %v168_v30 }
 0x1b3   :  { %v384_v32 = vpop.f32.mrb[0].mxu1 }
 0x1b4   :  { %v277_v33 = vadd.f32 %v384_v32, %v333_v31  ;;  %v271_v34 = vpop.f32.mrb[1].mxu1 }
 0x1b5   :  { %v272_v35 = vadd.f32 %v333_v31, %v271_v34 }
 0x1b6   :  { %312 = vst.msk [vmem:[%s531_s5 + $0x8] sm:$0xff] %vm310_vm5, %v277_v33 }
 0x1b7   :  { %311 = vst.msk [vmem:[%s531_s5] sm:$0xff] %vm310_vm5, %v272_v35  ;;  %v387_v36 = vpop.f32.mrb[2].mxu1 }
 0x1b8   :  { %v287_v37 = vadd.f32 %v387_v36, %v333_v31  ;;  %v281_v38 = vpop.f32.mrb[3].mxu1 }
 0x1b9   :  { %v282_v39 = vadd.f32 %v333_v31, %v281_v38 }
 0x1ba   :  { %314 = vst.msk [vmem:[%s531_s5 + $0x18] sm:$0xff] %vm310_vm5, %v287_v37 }
 0x1bb   :  { %313 = vst.msk [vmem:[%s531_s5 + $0x10] sm:$0xff] %vm310_vm5, %v282_v39  ;;  %v390_v40 = vpop.f32.mrb[4].mxu1 }
 0x1bc   :  { %v297_v41 = vadd.f32 %v390_v40, %v333_v31  ;;  %v291_v42 = vpop.f32.mrb[5].mxu1 }
 0x1bd   :  { %v292_v43 = vadd.f32 %v333_v31, %v291_v42 }
 0x1be   :  { %316 = vst.msk [vmem:[%s531_s5 + $0x28] sm:$0xff] %vm310_vm5, %v297_v41 }
 0x1bf   :  { %315 = vst.msk [vmem:[%s531_s5 + $0x20] sm:$0xff] %vm310_vm5, %v292_v43  ;;  %v393_v44 = vpop.f32.mrb[6].mxu1 }
 0x1c0   :  { %v307_v45 = vadd.f32 %v393_v44, %v333_v31  ;;  %v301_v46 = vpop.f32.mrb[7].mxu1 }
 0x1c1   :  { %v302_v47 = vadd.f32 %v333_v31, %v301_v46 }
 0x1c2   :  { %318 = vst.msk [vmem:[%s531_s5 + $0x38] sm:$0xff] %vm310_vm5, %v307_v45 }
 0x1c3   :  { %317 = vst.msk [vmem:[%s531_s5 + $0x30] sm:$0xff] %vm310_vm5, %v302_v47 }

// kernel: _lambda_.8
= control target key start
LH: loop header
LB: loop body
LE: loop exit
PB: predicated region body
PF: predicated region fallthrough
CT: control target
= control target key end

     0   :  { %s2207_s18 = smov 0   ;;  %s2469_s0 = inlined_call_operand.vmem [shape: f32[2,8,32], index: 0, kind: input, shape index: {}]   ;;  %s2470_s1 = inlined_call_operand.vmem [shape: f32[2,8,8], index: 1, kind: input, shape index: {}]   ;;  %s2471_s2 = inlined_call_operand.vmem [shape: f32[2,4,8,8], index: 2, kind: input, shape index: {}]   ;;  %s2472_s3 = inlined_call_operand.vmem [shape: f32[8,64], index: 3, kind: input, shape index: {}]   ;;  %s2473_s4 = inlined_call_operand.vmem [shape: f32[1,64], index: 4, kind: input, shape index: {}]   ;;  %s2474_s5 = inlined_call_operand.vmem [shape: f32[32,96], index: 5, kind: input, shape index: {}]   ;;  %s2475_s6 = inlined_call_operand.vmem [shape: f32[1,96], index: 6, kind: input, shape index: {}]   ;;  %s2476_s7 = inlined_call_operand.vmem [shape: f32[32,32], index: 7, kind: input, shape index: {}]   ;;  %s2477_s8 = inlined_call_operand.vmem [shape: f32[1,32], index: 8, kind: input, shape index: {}]   ;;  %s2478_s9 = inlined_call_operand.vmem [shape: f32[8,64], index: 9, kind: input, shape index: {}]   ;;  %s2479_s10 = inlined_call_operand.vmem [shape: f32[1,64], index: 10, kind: input, shape index: {}]   ;;  %s2480_s11 = inlined_call_operand.vmem [shape: f32[32,128], index: 11, kind: input, shape index: {}]   ;;  %s2481_s12 = inlined_call_operand.vmem [shape: f32[1,128], index: 12, kind: input, shape index: {}]   ;;  %s2482_s13 = inlined_call_operand.vmem [shape: f32[128,32], index: 13, kind: input, shape index: {}]   ;;  %s2483_s14 = inlined_call_operand.vmem [shape: f32[1,32], index: 14, kind: input, shape index: {}]   ;;  %s2484_s15 = inlined_call_operand.vmem [shape: f32[2,8,32], index: 15, kind: output, shape index: {}]  }
   0x1 LB: > { %s1819_s19 = sadd.s32 4294967295, %s2114_s18   ;;  %p1824_p0 = scmp.ge.s32.totalorder %s2114_s18, 1  ;;  %s2114_s18 = sphi %s2207_s18, %s25_s18  }
   0x2   : > { %p446_p1 = scmp.lt.s32.totalorder %s2114_s18, 3 }
   0x4   : > { %p447_p2 = pnand %p1824_p0, %p446_p1 }
   0x5   : > { %v512_v0 = vld [vmem:[%s2472_s3] sm:$0xff] (!%p447_p2)  ;;  %p497_p3 = scmp.lt.s32.totalorder (!%p447_p2), %s1819_s19, 1  ;;  %v2116_v1 = vmov (!%p447_p2), 0.0   ;;  %vm2117_vm0 = vmmov (!%p447_p2), 0   ;;  %vm520_vm1 = vcmask (!%p447_p2), 64512   ;;  %vm594_vm2 = vcmask (!%p447_p2), 261120  }
   0x6   : > { %450 = sbr.rel (%p447_p2) target bundleno = 2621 (0xa3d), region = 80  ;;  %1909 = vmatprep.subr.mxu0 (!%p447_p2), %v2116_v1  ;;  %1911 = vmatprep.mubr.msk.f32.mxu0 (!%p447_p2), %vm2117_vm0, %v2116_v1  ;;  %v616_v10 = vld [vmem:[%s2474_s5] sm:$0xff] (!%p447_p2)  ;;  %v617_v11 = vld [vmem:[%s2474_s5 + $0x8] sm:$0xff] (!%p447_p2)  ;;  %v618_v12 = vld [vmem:[%s2474_s5 + $0x10] sm:$0xff] (!%p447_p2)  ;;  %v2118_v13 = vmov (!%p447_p2), 0.0|0.0   ;;  %s2119_s26 = smov (!%p447_p2), 96  }
   0x7   : > { %1910 = vmatpush3.msra.mxu0 (!%p447_p2), %v512_v0  ;;  %1945 = vmatprep.subr.mxu1 (!%p447_p2), %v2116_v1  ;;  %v2028_v14 = vpack.c.bf16 (!%p447_p2), %v617_v11, %v616_v10  ;;  %v619_v15 = vld [vmem:[%s2474_s5 + $0x18] sm:$0xff] (!%p447_p2)  ;;  %v1828_v17 = vld [vmem:[%s2473_s4] ss:$0 sm:$0xff] (!%p447_p2)  ;;  %s2120_s29 = smov (!%p447_p2), 112   ;;  %s2121_s30 = smov (!%p447_p2), 120   ;;  %v1833_v46 = vld [vmem:[%s2471_s2 + $0x28] sm:$0xff] (!%p447_p2) }
   0x8   : > { %1947 = vmatprep.mubr.msk.f32.mxu1 (!%p447_p2), %vm2117_vm0, %v2116_v1  ;;  %2027 = vmatprep.subr.bf16.mxu0 (!%p447_p2), %v2118_v13  ;;  %v2031_v16 = vpack.c.bf16 (!%p447_p2), %v619_v15, %v618_v12  ;;  %v1830_v30 = vld [vmem:[%s2475_s6] ss:$0 sm:$0xff] (!%p447_p2)  ;;  %s2122_s16 = smov (!%p447_p2), 104   ;;  %v1834_v50 = vld [vmem:[%s2471_s2 + $0x30] sm:$0xff] (!%p447_p2)  ;;  %v1835_v55 = vld [vmem:[%s2471_s2 + $0x38] sm:$0xff] (!%p447_p2)  ;;  %s2124_s27 = smov (!%p447_p2), 8  }
   0x9   : > { %v1832_v41 = vld [vmem:[%s2471_s2 + $0x20] sm:$0xff] (!%p447_p2)  ;;  %vm1376_vm3 = vcmask (!%p447_p2), 130048   ;;  %vm1378_vm4 = vcmask (!%p447_p2), 195584  }
   0xd   : > { %s2486_s19 = smov (!%p497_p3, %s1819_s19), 1 }
   0xe   : > { %s2224_s22 = sshll.u32 %s2486_s19, 3 }
   0xf   : > { %s504_s25 = scalar_lea.vmem %s2470_s1, %s2224_s22  ;;  %s500_s28 = scalar_lea.vmem %s2469_s0, %s2224_s22 }
  0x10   : > { %v2230_v2 = vld [vmem:[%s504_s25] sm:$0xff] }
  0x11   : > { %1912 = vmatmul.mubr.msk.f32.vlgmr.msra.gmra.mrb[0].mxu0 %vm520_vm1, %v2230_v2  ;;  %v2238_v3 = vld [vmem:[%s500_s28] sm:$0xff]  ;;  %s2123_s28 = smov 64  }
  0x12   : > { %v595_v4 = vsel %vm594_vm2, %v2238_v3, 0.0  ;;  %1922 = vmatprep.mubr.msk.f32.mxu0 %vm2117_vm0, %v2116_v1  ;;  %2029 = vmatpush3.bf16.msra.mxu0 %v2028_v14 }
  0x13   : > { %596 = vadd.xlane.f32.xlu0 %v595_v4  ;;  %2030 = vmatprep.subr.bf16.mxu0 %v2118_v13 }
  0x16   : > { %2032 = vmatpush3.bf16.msra.mxu0 %v2031_v16 }
  0x17   : > { %1925 = vmatprep.subr.mxu0 %v2116_v1 }
  0xa0   : > { %v597_v5 = vpop.xlane.xlu0 %596 }
  0xa1   : > { %v599_v6 = vmul.f32 0.03125, %v597_v5 }
  0xa3   : > { %v600_v7 = vsub.f32 %v2238_v3, %v599_v6 }
  0xa5   : > { %v601_v8 = vmul.f32 %v600_v7, %v600_v7 }
  0xa7   : > { %v602_v9 = vsel %vm594_vm2, %v601_v8, 0.0 }
  0xa8   : > { %603 = vadd.xlane.f32.xlu0 %v602_v9 }
  0xe4   : > { %v590_v18 = vpop.f32.mrb[0].mxu0 }
  0xe5   : > { %v591_v19 = vadd.f32 %v1828_v17, %v590_v18  ;;  %v1913_v20 = vpop.f32.mrb[1].mxu0 }
  0xe7   : > { %612 = vrot.lane.b32.xlu1 %v591_v19, %s2119_s26  ;;  %v609_v26 = vadd.f32 1.0, %v591_v19 }
 0x135   : > { %v604_v21 = vpop.xlane.xlu0 %603 }
 0x136   : > { %v605_v22 = vmul.f32 0.03125, %v604_v21 }
 0x138   : > { %v606_v23 = vadd.f32 1e-05, %v605_v22 }
 0x13a   : > { %2088 = vrsqrt.f32 %v606_v23 }
 0x144   : > { %v2089_v24 = vpop.eup %2088 }
 0x145   : > { %v608_v25 = vmul.f32 %v2089_v24, %v600_v7 }
 0x147   : > { %v610_v27 = vmul.f32 %v609_v26, %v608_v25 }
 0x159   : > { %v613_v28 = vpop.permute.xlu1 %612 }
 0x15a   : > { %v615_v29 = vadd.f32 %v613_v28, %v610_v27 }
 0x15c   : > { %1923 = vmatmul.mubr.msk.f32.vlgmr.msra.gmra.mrb[2].mxu0 %vm594_vm2, %v615_v29 }
 0x15d   : > { %1927 = vmatprep.mubr.msk.f32.mxu0 %vm2117_vm0, %v2116_v1 }
 0x22f   : > { %v696_v31 = vpop.f32.mrb[2].mxu0 }
 0x230   : > { %v697_v32 = vadd.f32 %v1830_v30, %v696_v31  ;;  %v1924_v33 = vpop.f32.mrb[3].mxu0 }
 0x232   : > { %703 = vrot.lane.b32.xlu0 %v697_v32, %s2120_s29  ;;  %701 = vrot.lane.b32.xlu1 %v697_v32, %s2121_s30  ;;  %s2126_s29 = smov 24  }
 0x236   : > { %705 = vrot.lane.b32.xlu1 %v697_v32, %s2122_s16 }
 0x23a   : > { %711 = vrot.lane.b32.xlu1 %v697_v32, %s2119_s26 }
 0x2a4   : > { %v702_v34 = vpop.permute.xlu1 %701  ;;  %v2273_v35 = vpop.permute.xlu0 %703 }
 0x2a5   : > { %787 = vrot.lane.b32.xlu1 %v702_v34, %s2119_s26 }
 0x2a8   : > { %v2275_v36 = vpop.permute.xlu1 %705 }
 0x2a9   : > { %863 = vrot.lane.b32.xlu1 %v2273_v35, %s2119_s26 }
 0x2ac   : > { %v712_v37 = vpop.permute.xlu1 %711 }
 0x2ad   : > { %939 = vrot.lane.b32.xlu1 %v2275_v36, %s2119_s26  ;;  %1926 = vmatpush3.xpose.msk.msra.mxu0 %vm520_vm1, %v712_v37 }
 0x2ae   : > { %1930 = vmatprep.subr.mxu0 %v2116_v1 }
 0x2b0   : > { %1928 = vmatmul.mubr.msk.f32.vlgmr.msra.gmra.mrb[4].mxu0 %vm520_vm1, %v697_v32 }
 0x2b1   : > { %1932 = vmatprep.mubr.msk.f32.mxu0 %vm2117_vm0, %v2116_v1 }
 0x317   : > { %v788_v38 = vpop.permute.xlu1 %787 }
 0x318   : > { %1931 = vmatpush3.xpose.msk.msra.mxu0 %vm520_vm1, %v788_v38 }
 0x319   : > { %1935 = vmatprep.subr.mxu0 %v2116_v1 }
 0x31b   : > { %1933 = vmatmul.mubr.msk.f32.vlgmr.msra.gmra.mrb[6].mxu0 %vm520_vm1, %v702_v34  ;;  %v864_v39 = vpop.permute.xlu1 %863 }
 0x31c   : > { %1936 = vmatpush3.xpose.msk.msra.mxu0 %vm520_vm1, %v864_v39  ;;  %1937 = vmatprep.mubr.msk.f32.mxu0 %vm2117_vm0, %v2116_v1  ;;  %v1380_v39 = vld [vmem:[%s2476_s7] sm:$0xff] }
 0x31d   : > { %1940 = vmatprep.subr.mxu0 %v2116_v1 }
 0x31f   : > { %1938 = vmatmul.mubr.msk.f32.vlgmr.msra.gmra.mrb[8].mxu0 %vm520_vm1, %v2273_v35  ;;  %v940_v40 = vpop.permute.xlu1 %939 }
 0x320   : > { %1941 = vmatpush3.xpose.msk.msra.mxu0 %vm520_vm1, %v940_v40  ;;  %1942 = vmatprep.mubr.msk.f32.mxu0 %vm2117_vm0, %v2116_v1  ;;  %v1381_v40 = vld [vmem:[%s2476_s7 + $0x8] sm:$0xff] }
 0x321   : > { %1950 = vmatprep.subr.mxu0 %v2116_v1 }
 0x323   : > { %1943 = vmatmul.mubr.msk.f32.vlgmr.msra.gmra.mrb[10].mxu0 %vm520_vm1, %v2275_v36 }
 0x324   : > { %1952 = vmatprep.mubr.msk.f32.mxu0 %vm2117_vm0, %v2116_v1 }
 0x383   : > { %v783_v42 = vpop.f32.mrb[4].mxu0 }
 0x384   : > { %v784_v43 = vadd.f32 %v1832_v41, %v783_v42  ;;  %v1929_v44 = vpop.f32.mrb[5].mxu0  ;;  %v2034_v41 = vpack.c.bf16 %v1381_v40, %v1380_v39  ;;  %v1382_v42 = vld [vmem:[%s2476_s7 + $0x10] sm:$0xff] }
 0x386   : > { %v1015_v45 = vsel %vm520_vm1, %v784_v43, -inf }
 0x387   : > { %1016 = vmax.xlane.f32.xlu1 %v1015_v45  ;;  %v1466_v45 = vld [vmem:[%s2478_s9] sm:$0xff] }
 0x3ee   : > { %v859_v47 = vpop.f32.mrb[6].mxu0 }
 0x3ef   : > { %v860_v48 = vadd.f32 %v1833_v46, %v859_v47  ;;  %v1934_v49 = vpop.f32.mrb[7].mxu0 }
 0x3f1   : > { %v1018_v51 = vsel %vm520_vm1, %v860_v48, -inf }
 0x3f2   : > { %1019 = vmax.xlane.f32.xlu0 %v1018_v51  ;;  %v935_v52 = vpop.f32.mrb[8].mxu0 }
 0x3f3   : > { %v936_v53 = vadd.f32 %v1834_v50, %v935_v52  ;;  %v1939_v54 = vpop.f32.mrb[9].mxu0 }
 0x3f5   : > { %v1021_v56 = vsel %vm520_vm1, %v936_v53, -inf }
 0x3f6   : > { %1022 = vmax.xlane.f32.xlu0 %v1021_v56  ;;  %v1011_v57 = vpop.f32.mrb[10].mxu0 }
 0x3f7   : > { %v1012_v58 = vadd.f32 %v1835_v55, %v1011_v57  ;;  %v1944_v59 = vpop.f32.mrb[11].mxu0 }
 0x3f9   : > { %v1024_v60 = vsel %vm520_vm1, %v1012_v58, -inf }
 0x3fa   : > { %1025 = vmax.xlane.f32.xlu1 %v1024_v60 }
 0x40b   : > { %1135 = vrot.lane.b32.xlu1 %v702_v34, %s2123_s28 }
 0x40c   : > { %1059 = vrot.lane.b32.xlu0 %v697_v32, %s2123_s28 }
 0x414   : > { %v1017_v61 = vpop.xlane.xlu1 %1016 }
 0x415   : > { %v1027_v62 = vsub.f32 %v784_v43, %v1017_v61  ;;  %v1383_v43 = vld [vmem:[%s2476_s7 + $0x18] sm:$0xff] }
 0x416   : > { %v2037_v44 = vpack.c.bf16 %v1383_v43, %v1382_v42 }
 0x417   : > { %v1031_v63 = vmul.f32 1.442695, %v1027_v62 }
 0x419   : > { %2090 = vpow2.f32 %v1031_v63  ;;  %v1850_v63 = vld [vmem:[%s2479_s10] ss:$0 sm:$0xff] }
 0x423   : > { %v2091_v0 = vpop.eup %2090 }
 0x424   : > { %v1039_v4 = vsel %vm520_vm1, %v2091_v0, 0.0 }
 0x42b   : > { %1040 = vadd.xlane.f32.xlu0 %v1039_v4 }
 0x47f   : > { %v1020_v5 = vpop.xlane.xlu0 %1019 }
 0x480   : > { %v1028_v6 = vsub.f32 %v860_v48, %v1020_v5 }
 0x482   : > { %v1033_v7 = vmul.f32 1.442695, %v1028_v6 }
 0x483   : > { %v1023_v8 = vpop.xlane.xlu0 %1022 }
 0x484   : > { %2092 = vpow2.f32 %v1033_v7  ;;  %v1029_v9 = vsub.f32 %v936_v53, %v1023_v8 }
 0x486   : > { %v1035_v10 = vmul.f32 1.442695, %v1029_v9  ;;  %v1564_v9 = vld [vmem:[%s2480_s11] sm:$0xff] }
 0x487   : > { %v1060_v11 = vpop.permute.xlu0 %1059  ;;  %v1026_v12 = vpop.xlane.xlu1 %1025 }
 0x488   : > { %2094 = vpow2.f32 %v1035_v10  ;;  %v1030_v14 = vsub.f32 %v1012_v58, %v1026_v12  ;;  %1946 = vmatpush3.msra.mxu1 %v1060_v11  ;;  %v1849_v58 = vld [vmem:[%s2477_s8] ss:$0 sm:$0xff]  ;;  %v1565_v10 = vld [vmem:[%s2480_s11 + $0x8] sm:$0xff]  ;;  %v1566_v11 = vld [vmem:[%s2480_s11 + $0x10] sm:$0xff] }
 0x489   : > { %1955 = vmatprep.subr.mxu1 %v2116_v1  ;;  %v2040_v12 = vpack.c.bf16 %v1565_v10, %v1564_v9 }
 0x48a   : > { %v1037_v15 = vmul.f32 1.442695, %v1030_v14  ;;  %v1567_v14 = vld [vmem:[%s2480_s11 + $0x18] sm:$0xff] }
 0x48b   : > { %v1136_v16 = vpop.permute.xlu1 %1135 }
 0x48c   : > { %2096 = vpow2.f32 %v1037_v15  ;;  %1951 = vmatpush3.msra.mxu0 %v1136_v16  ;;  %v2043_v15 = vpack.c.bf16 %v1567_v14, %v1566_v11  ;;  %v1649_v16 = vld [vmem:[%s2482_s13] sm:$0xff] }
 0x48d   : > { %1960 = vmatprep.subr.mxu0 %v2116_v1 }
 0x48e   : > { %v2093_v17 = vpop.eup %2092 }
 0x48f   : > { %v1042_v18 = vsel %vm520_vm1, %v2093_v17, 0.0 }
 0x490   : > { %1043 = vadd.xlane.f32.xlu1 %v1042_v18  ;;  %v1651_v18 = vld [vmem:[%s2482_s13 + $0x10] sm:$0xff] }
 0x492   : > { %v2095_v19 = vpop.eup %2094 }
 0x493   : > { %v1045_v20 = vsel %vm520_vm1, %v2095_v19, 0.0 }
 0x494   : > { %1046 = vadd.xlane.f32.xlu0 %v1045_v20  ;;  %v1652_v20 = vld [vmem:[%s2482_s13 + $0x18] sm:$0xff] }
 0x496   : > { %v2097_v21 = vpop.eup %2096 }
 0x497   : > { %v1048_v22 = vsel %vm520_vm1, %v2097_v21, 0.0 }
 0x498   : > { %1049 = vadd.xlane.f32.xlu1 %v1048_v22  ;;  %v1653_v22 = vld [vmem:[%s2482_s13 + $0x20] sm:$0xff] }
 0x4a9   : > { %1211 = vrot.lane.b32.xlu1 %v2273_v35, %s2123_s28 }
 0x4aa   : > { %1287 = vrot.lane.b32.xlu0 %v2275_v36, %s2123_s28  ;;  %s2125_s28 = smov 16  }
 0x4b8   : > { %v1041_v23 = vpop.xlane.xlu0 %1040 }
 0x4b9   : > { %2098 = vrcp.f32 %v1041_v23  ;;  %v1654_v23 = vld [vmem:[%s2482_s13 + $0x28] sm:$0xff] }
 0x4c3   : > { %v2099_v24 = vpop.eup %2098 }
 0x4c4   : > { %v1055_v25 = vmul.f32 %v2099_v24, %v2091_v0  ;;  %v2052_v24 = vpack.c.bf16 %v1654_v23, %v1653_v22 }
 0x4c6   : > { %1948 = vmatmul.mubr.msk.f32.vlgmr.msra.gmra.mrb[0].mxu1 %vm520_vm1, %v1055_v25  ;;  %v1655_v25 = vld [vmem:[%s2482_s13 + $0x30] sm:$0xff] }
 0x4c7   : > { %1957 = vmatprep.mubr.msk.f32.mxu1 %vm2117_vm0, %v2116_v1 }
 0x51d   : > { %v1044_v26 = vpop.xlane.xlu1 %1043 }
 0x51e   : > { %2100 = vrcp.f32 %v1044_v26  ;;  %v1656_v26 = vld [vmem:[%s2482_s13 + $0x38] sm:$0xff] }
 0x521   : > { %v1047_v27 = vpop.xlane.xlu0 %1046 }
 0x522   : > { %2102 = vrcp.f32 %v1047_v27  ;;  %v2055_v27 = vpack.c.bf16 %v1656_v26, %v1655_v25 }
 0x525   : > { %v1050_v28 = vpop.xlane.xlu1 %1049  ;;  %v1288_v32 = vpop.permute.xlu0 %1287 }
 0x526   : > { %2104 = vrcp.f32 %v1050_v28  ;;  %v1657_v28 = vld [vmem:[%s2482_s13 + $0x40] sm:$0xff] }
 0x528   : > { %v2101_v29 = vpop.eup %2100 }
 0x529   : > { %v1056_v30 = vmul.f32 %v2101_v29, %v2093_v17  ;;  %v1212_v31 = vpop.permute.xlu1 %1211  ;;  %v1650_v17 = vld [vmem:[%s2482_s13 + $0x8] sm:$0xff] }
 0x52a   : > { %1956 = vmatpush3.msra.mxu1 %v1212_v31  ;;  %v1658_v29 = vld [vmem:[%s2482_s13 + $0x48] sm:$0xff]  ;;  %v1659_v31 = vld [vmem:[%s2482_s13 + $0x50] sm:$0xff] }
 0x52b   : > { %1953 = vmatmul.mubr.msk.f32.vlgmr.msra.gmra.mrb[12].mxu0 %vm520_vm1, %v1056_v30  ;;  %2033 = vmatprep.subr.bf16.mxu1 %v2118_v13  ;;  %v2058_v30 = vpack.c.bf16 %v1658_v29, %v1657_v28 }
 0x52c   : > { %v2103_v33 = vpop.eup %2102  ;;  %1961 = vmatpush3.msra.mxu0 %v1288_v32  ;;  %1962 = vmatprep.mubr.msk.f32.mxu0 %vm2117_vm0, %v2116_v1  ;;  %v1660_v32 = vld [vmem:[%s2482_s13 + $0x58] sm:$0xff] }
 0x52d   : > { %v1057_v34 = vmul.f32 %v2103_v33, %v2095_v19  ;;  %1976 = vmatprep.subr.mxu0 %v2116_v1  ;;  %v2046_v19 = vpack.c.bf16 %v1650_v17, %v1649_v16  ;;  %v2061_v33 = vpack.c.bf16 %v1660_v32, %v1659_v31 }
 0x52f   : > { %1958 = vmatmul.mubr.msk.f32.vlgmr.msra.gmra.mrb[2].mxu1 %vm520_vm1, %v1057_v34  ;;  %v1661_v34 = vld [vmem:[%s2482_s13 + $0x60] sm:$0xff] }
 0x530   : > { %v2105_v35 = vpop.eup %2104  ;;  %1973 = vmatprep.mubr.msk.f32.mxu1 %vm2117_vm0, %v2116_v1  ;;  %2035 = vmatpush3.bf16.msra.mxu1 %v2034_v41 }
 0x531   : > { %v1058_v36 = vmul.f32 %v2105_v35, %v2097_v21  ;;  %2036 = vmatprep.subr.bf16.mxu1 %v2118_v13  ;;  %v2049_v21 = vpack.c.bf16 %v1652_v20, %v1651_v18  ;;  %v1662_v35 = vld [vmem:[%s2482_s13 + $0x68] sm:$0xff] }
 0x533   : > { %1963 = vmatmul.mubr.msk.f32.vlgmr.msra.gmra.mrb[14].mxu0 %vm520_vm1, %v1058_v36  ;;  %v2064_v36 = vpack.c.bf16 %v1662_v35, %v1661_v34 }
 0x534   : > { %1978 = vmatprep.mubr.msk.f32.mxu0 %vm2117_vm0, %v2116_v1  ;;  %2038 = vmatpush3.bf16.msra.mxu1 %v2037_v44 }
 0x535   : > { %2045 = vmatprep.subr.bf16.mxu1 %v2118_v13  ;;  %1977 = vmatpush3.msra.mxu0 %v1466_v45 }
 0x536   : > { %2039 = vmatprep.subr.bf16.mxu0 %v2118_v13 }
 0x537   : > { %1979 = vmatmul.mubr.msk.f32.vlgmr.msra.gmra.mrb[16].mxu0 %vm520_vm1, %v2230_v2 }
 0x538   : > { %1989 = vmatprep.mubr.msk.f32.mxu0 %vm2117_vm0, %v2116_v1  ;;  %2041 = vmatpush3.bf16.msra.mxu0 %v2040_v12 }
 0x539   : > { %2042 = vmatprep.subr.bf16.mxu0 %v2118_v13 }
 0x53c   : > { %2044 = vmatpush3.bf16.msra.mxu0 %v2043_v15 }
 0x599   : > { %v1131_v37 = vpop.f32.mrb[0].mxu1 }
 0x59a   : > { %v1949_v38 = vpop.f32.mrb[1].mxu1 }
 0x5fe   : > { %v1207_v46 = vpop.f32.mrb[12].mxu0 }
 0x5ff   : > { %1364 = vrot.lane.b32.xlu1 %v1207_v46, %s2124_s27  ;;  %v1954_v47 = vpop.f32.mrb[13].mxu0  ;;  %v1663_v46 = vld [vmem:[%s2482_s13 + $0x70] sm:$0xff] }
 0x602   : > { %v1283_v48 = vpop.f32.mrb[2].mxu1 }
 0x603   : > { %1368 = vrot.lane.b32.xlu0 %v1283_v48, %s2125_s28  ;;  %v1959_v49 = vpop.f32.mrb[3].mxu1  ;;  %v1852_v48 = vld [vmem:[%s2481_s12] ss:$0 sm:$0xff]  ;;  %s509_s28 = scalar_lea.vmem %s2484_s15, %s2224_s22 }
 0x606   : > { %v1359_v50 = vpop.f32.mrb[14].mxu0 }
 0x607   : > { %1372 = vrot.lane.b32.xlu1 %v1359_v50, %s2126_s29  ;;  %v1964_v51 = vpop.f32.mrb[15].mxu0 }
 0x60a   : > { %v1540_v0 = vpop.f32.mrb[16].mxu0 }
 0x60b   : > { %v1980_v4 = vpop.f32.mrb[17].mxu0 }
 0x671   : > { %v1365_v52 = vpop.permute.xlu1 %1364 }
 0x672   : > { %v1375_v53 = vsel %vm520_vm1, %v1131_v37, %v1365_v52 }
 0x675   : > { %v1369_v2 = vpop.permute.xlu0 %1368 }
 0x676   : > { %v1377_v54 = vsel %vm1376_vm3, %v1375_v53, %v1369_v2  ;;  %v1854_v53 = vld [vmem:[%s2483_s14] ss:$0 sm:$0xff] }
 0x679   : > { %v1373_v55 = vpop.permute.xlu1 %1372 }
 0x67a   : > { %v1379_v56 = vsel %vm1378_vm4, %v1377_v54, %v1373_v55 }
 0x67b   : > { %1974 = vmatmul.mubr.msk.f32.vlgmr.msra.gmra.mrb[4].mxu1 %vm594_vm2, %v1379_v56 }
 0x67c   : > { %2024 = vmatprep.mubr.msk.f32.mxu1 %vm2117_vm0, %v2116_v1  ;;  %v1541_v1 = vadd.f32 %v1850_v63, %v1540_v0  ;;  %2047 = vmatpush3.bf16.msra.mxu1 %v2046_v19 }
 0x67d   : > { %2048 = vmatprep.subr.bf16.mxu1 %v2118_v13 }
 0x67e   : > { %v1557_v41 = vadd.f32 1.0, %v1541_v1 }
 0x680   : > { %2050 = vmatpush3.bf16.msra.mxu1 %v2049_v21 }
 0x681   : > { %2051 = vmatprep.subr.bf16.mxu1 %v2118_v13 }
 0x684   : > { %2053 = vmatpush3.bf16.msra.mxu1 %v2052_v24 }
 0x685   : > { %2054 = vmatprep.subr.bf16.mxu1 %v2118_v13 }
 0x688   : > { %2056 = vmatpush3.bf16.msra.mxu1 %v2055_v27 }
 0x689   : > { %2057 = vmatprep.subr.bf16.mxu1 %v2118_v13 }
 0x68c   : > { %2059 = vmatpush3.bf16.msra.mxu1 %v2058_v30 }
 0x68d   : > { %2060 = vmatprep.subr.bf16.mxu1 %v2118_v13 }
 0x690   : > { %2062 = vmatpush3.bf16.msra.mxu1 %v2061_v33 }
 0x691   : > { %2063 = vmatprep.subr.bf16.mxu1 %v2118_v13 }
 0x694   : > { %2065 = vmatpush3.bf16.msra.mxu1 %v2064_v36 }
 0x695   : > { %2066 = vmatprep.subr.bf16.mxu1 %v2118_v13  ;;  %v1664_v13 = vld [vmem:[%s2482_s13 + $0x78] sm:$0xff] }
 0x696   : > { %v2067_v47 = vpack.c.bf16 %v1664_v13, %v1663_v46 }
 0x698   : > { %2068 = vmatpush3.bf16.msra.mxu1 %v2067_v47 }
 0x74e   : > { %v1453_v57 = vpop.f32.mrb[4].mxu1 }
 0x74f   : > { %v1457_v59 = vadd.f32 %v1453_v57, %v2238_v3  ;;  %v1975_v60 = vpop.f32.mrb[5].mxu1 }
 0x751   : > { %v2375_v61 = vadd.f32 %v1849_v58, %v1457_v59 }
 0x753   : > { %v1544_v62 = vsel %vm594_vm2, %v2375_v61, 0.0 }
 0x754   : > { %1545 = vadd.xlane.f32.xlu0 %v1544_v62 }
 0x76a   : > { %1560 = vrot.lane.b32.xlu0 %v1541_v1, %s2119_s26 }
 0x7e1   : > { %v1546_v5 = vpop.xlane.xlu0 %1545 }
 0x7e2   : > { %v1547_v6 = vmul.f32 0.03125, %v1546_v5 }
 0x7e4   : > { %v1548_v3 = vsub.f32 %v2375_v61, %v1547_v6 }
 0x7e5   : > { %v1561_v43 = vpop.permute.xlu0 %1560 }
 0x7e6   : > { %v1549_v7 = vmul.f32 %v1548_v3, %v1548_v3 }
 0x7e8   : > { %v1550_v8 = vsel %vm594_vm2, %v1549_v7, 0.0 }
 0x7e9   : > { %1551 = vadd.xlane.f32.xlu1 %v1550_v8 }
 0x876   : > { %v1552_v37 = vpop.xlane.xlu1 %1551 }
 0x877   : > { %v1553_v38 = vmul.f32 0.03125, %v1552_v37 }
 0x879   : > { %v1554_v39 = vadd.f32 1e-05, %v1553_v38 }
 0x87b   : > { %2106 = vrsqrt.f32 %v1554_v39 }
 0x885   : > { %v2107_v40 = vpop.eup %2106 }
 0x886   : > { %v1556_v42 = vmul.f32 %v2107_v40, %v1548_v3 }
 0x888   : > { %v1558_v44 = vmul.f32 %v1557_v41, %v1556_v42 }
 0x88a   : > { %v1563_v45 = vadd.f32 %v1561_v43, %v1558_v44 }
 0x88c   : > { %1990 = vmatmul.mubr.msk.f32.vlgmr.msra.gmra.mrb[18].mxu0 %vm594_vm2, %v1563_v45 }
 0x95f   : > { %v1644_v49 = vpop.f32.mrb[18].mxu0 }
 0x960   : > { %v1645_v50 = vadd.f32 %v1852_v48, %v1644_v49  ;;  %v1991_v51 = vpop.f32.mrb[19].mxu0 }
 0x962   : > { %v1648_v52 = vmax.f32 %v1645_v50, 0.0 }
 0x964   : > { %2025 = vmatmul.mubr.f32.vlgmr.msra.gmra.mrb[6].mxu1 %v1648_v52 }
 0xa37   : > { %v1731_v2 = vpop.f32.mrb[6].mxu1 }
 0xa38   : > { %v1735_v54 = vadd.f32 %v1731_v2, %v2375_v61  ;;  %v2026_v55 = vpop.f32.mrb[7].mxu1 }
 0xa3a   : > { %v1743_v56 = vadd.f32 %v1854_v53, %v1735_v54 }
 0xa3c   : > { %1744 = vst.msk [vmem:[%s509_s28] sm:$0xff] %vm594_vm2, %v1743_v56 }
 0xa3d PF: > { %s25_s18 = sadd.s32 1, %s2114_s18  }
 0xa3e   : > { %p22_p4 = scmp.ge.s32.totalorder %s25_s18, 4  }
 0xa40   :  { %24 = sbr.rel (!%p22_p4) target bundleno = 1 (0x1), region = 116 }

// kernel: _lambda_.7
= control target key start
LH: loop header
LB: loop body
LE: loop exit
PB: predicated region body
PF: predicated region fallthrough
CT: control target
= control target key end

     0   :  { %s2190_s18 = smov 0   ;;  %s2452_s0 = inlined_call_operand.vmem [shape: f32[2,8,32], index: 0, kind: input, shape index: {}]   ;;  %s2453_s1 = inlined_call_operand.vmem [shape: f32[2,8,8], index: 1, kind: input, shape index: {}]   ;;  %s2454_s2 = inlined_call_operand.vmem [shape: f32[2,4,8,8], index: 2, kind: input, shape index: {}]   ;;  %s2455_s3 = inlined_call_operand.vmem [shape: f32[8,64], index: 3, kind: input, shape index: {}]   ;;  %s2456_s4 = inlined_call_operand.vmem [shape: f32[1,64], index: 4, kind: input, shape index: {}]   ;;  %s2457_s5 = inlined_call_operand.vmem [shape: f32[32,96], index: 5, kind: input, shape index: {}]   ;;  %s2458_s6 = inlined_call_operand.vmem [shape: f32[1,96], index: 6, kind: input, shape index: {}]   ;;  %s2459_s7 = inlined_call_operand.vmem [shape: f32[32,32], index: 7, kind: input, shape index: {}]   ;;  %s2460_s8 = inlined_call_operand.vmem [shape: f32[1,32], index: 8, kind: input, shape index: {}]   ;;  %s2461_s9 = inlined_call_operand.vmem [shape: f32[8,64], index: 9, kind: input, shape index: {}]   ;;  %s2462_s10 = inlined_call_operand.vmem [shape: f32[1,64], index: 10, kind: input, shape index: {}]   ;;  %s2463_s11 = inlined_call_operand.vmem [shape: f32[32,128], index: 11, kind: input, shape index: {}]   ;;  %s2464_s12 = inlined_call_operand.vmem [shape: f32[1,128], index: 12, kind: input, shape index: {}]   ;;  %s2465_s13 = inlined_call_operand.vmem [shape: f32[128,32], index: 13, kind: input, shape index: {}]   ;;  %s2466_s14 = inlined_call_operand.vmem [shape: f32[1,32], index: 14, kind: input, shape index: {}]   ;;  %s2467_s15 = inlined_call_operand.vmem [shape: f32[2,8,32], index: 15, kind: output, shape index: {}]  }
   0x1 LB: > { %s1807_s19 = sadd.s32 4294967295, %s2097_s18   ;;  %p1811_p0 = scmp.ge.s32.totalorder %s2097_s18, 1  ;;  %s2097_s18 = sphi %s2190_s18, %s25_s18  }
   0x2   : > { %p445_p1 = scmp.lt.s32.totalorder %s2097_s18, 3 }
   0x4   : > { %p446_p2 = pnand %p1811_p0, %p445_p1 }
   0x5   : > { %v509_v0 = vld [vmem:[%s2455_s3] sm:$0xff] (!%p446_p2)  ;;  %p495_p3 = scmp.lt.s32.totalorder (!%p446_p2), %s1807_s19, 1  ;;  %v2099_v1 = vmov (!%p446_p2), 0.0   ;;  %vm2100_vm0 = vmmov (!%p446_p2), 0   ;;  %vm517_vm1 = vcmask (!%p446_p2), 64512   ;;  %vm591_vm2 = vcmask (!%p446_p2), 261120  }
   0x6   : > { %449 = sbr.rel (%p446_p2) target bundleno = 2621 (0xa3d), region = 80  ;;  %1892 = vmatprep.subr.mxu0 (!%p446_p2), %v2099_v1  ;;  %1894 = vmatprep.mubr.msk.f32.mxu0 (!%p446_p2), %vm2100_vm0, %v2099_v1  ;;  %v613_v10 = vld [vmem:[%s2457_s5] sm:$0xff] (!%p446_p2)  ;;  %v614_v11 = vld [vmem:[%s2457_s5 + $0x8] sm:$0xff] (!%p446_p2)  ;;  %v615_v12 = vld [vmem:[%s2457_s5 + $0x10] sm:$0xff] (!%p446_p2)  ;;  %v2101_v13 = vmov (!%p446_p2), 0.0|0.0   ;;  %s2102_s26 = smov (!%p446_p2), 96  }
   0x7   : > { %1893 = vmatpush3.msra.mxu0 (!%p446_p2), %v509_v0  ;;  %1928 = vmatprep.subr.mxu1 (!%p446_p2), %v2099_v1  ;;  %v2011_v14 = vpack.c.bf16 (!%p446_p2), %v614_v11, %v613_v10  ;;  %v616_v15 = vld [vmem:[%s2457_s5 + $0x18] sm:$0xff] (!%p446_p2)  ;;  %v1815_v17 = vld [vmem:[%s2456_s4] ss:$0 sm:$0xff] (!%p446_p2)  ;;  %s2103_s29 = smov (!%p446_p2), 112   ;;  %s2104_s30 = smov (!%p446_p2), 120   ;;  %v705_v46 = vld [vmem:[%s2454_s2 + $0x8] sm:$0xff] (!%p446_p2) }
   0x8   : > { %1930 = vmatprep.mubr.msk.f32.mxu1 (!%p446_p2), %vm2100_vm0, %v2099_v1  ;;  %2010 = vmatprep.subr.bf16.mxu0 (!%p446_p2), %v2101_v13  ;;  %v2014_v16 = vpack.c.bf16 (!%p446_p2), %v616_v15, %v615_v12  ;;  %v1817_v30 = vld [vmem:[%s2458_s6] ss:$0 sm:$0xff] (!%p446_p2)  ;;  %s2105_s16 = smov (!%p446_p2), 104   ;;  %v706_v50 = vld [vmem:[%s2454_s2 + $0x10] sm:$0xff] (!%p446_p2)  ;;  %v707_v55 = vld [vmem:[%s2454_s2 + $0x18] sm:$0xff] (!%p446_p2)  ;;  %s2107_s27 = smov (!%p446_p2), 8  }
   0x9   : > { %v704_v41 = vld [vmem:[%s2454_s2] sm:$0xff] (!%p446_p2)  ;;  %vm1373_vm3 = vcmask (!%p446_p2), 130048   ;;  %vm1375_vm4 = vcmask (!%p446_p2), 195584  }
   0xd   : > { %s2469_s19 = smov (!%p495_p3, %s1807_s19), 1 }
   0xe   : > { %s2207_s22 = sshll.u32 %s2469_s19, 3 }
   0xf   : > { %s502_s25 = scalar_lea.vmem %s2453_s1, %s2207_s22  ;;  %s498_s28 = scalar_lea.vmem %s2452_s0, %s2207_s22 }
  0x10   : > { %v2213_v2 = vld [vmem:[%s502_s25] sm:$0xff] }
  0x11   : > { %1895 = vmatmul.mubr.msk.f32.vlgmr.msra.gmra.mrb[0].mxu0 %vm517_vm1, %v2213_v2  ;;  %v2221_v3 = vld [vmem:[%s498_s28] sm:$0xff]  ;;  %s2106_s28 = smov 64  }
  0x12   : > { %v592_v4 = vsel %vm591_vm2, %v2221_v3, 0.0  ;;  %1905 = vmatprep.mubr.msk.f32.mxu0 %vm2100_vm0, %v2099_v1  ;;  %2012 = vmatpush3.bf16.msra.mxu0 %v2011_v14 }
  0x13   : > { %593 = vadd.xlane.f32.xlu0 %v592_v4  ;;  %2013 = vmatprep.subr.bf16.mxu0 %v2101_v13 }
  0x16   : > { %2015 = vmatpush3.bf16.msra.mxu0 %v2014_v16 }
  0x17   : > { %1908 = vmatprep.subr.mxu0 %v2099_v1 }
  0xa0   : > { %v594_v5 = vpop.xlane.xlu0 %593 }
  0xa1   : > { %v596_v6 = vmul.f32 0.03125, %v594_v5 }
  0xa3   : > { %v597_v7 = vsub.f32 %v2221_v3, %v596_v6 }
  0xa5   : > { %v598_v8 = vmul.f32 %v597_v7, %v597_v7 }
  0xa7   : > { %v599_v9 = vsel %vm591_vm2, %v598_v8, 0.0 }
  0xa8   : > { %600 = vadd.xlane.f32.xlu0 %v599_v9 }
  0xe4   : > { %v587_v18 = vpop.f32.mrb[0].mxu0 }
  0xe5   : > { %v588_v19 = vadd.f32 %v1815_v17, %v587_v18  ;;  %v1896_v20 = vpop.f32.mrb[1].mxu0 }
  0xe7   : > { %609 = vrot.lane.b32.xlu1 %v588_v19, %s2102_s26  ;;  %v606_v26 = vadd.f32 1.0, %v588_v19 }
 0x135   : > { %v601_v21 = vpop.xlane.xlu0 %600 }
 0x136   : > { %v602_v22 = vmul.f32 0.03125, %v601_v21 }
 0x138   : > { %v603_v23 = vadd.f32 1e-05, %v602_v22 }
 0x13a   : > { %2071 = vrsqrt.f32 %v603_v23 }
 0x144   : > { %v2072_v24 = vpop.eup %2071 }
 0x145   : > { %v605_v25 = vmul.f32 %v2072_v24, %v597_v7 }
 0x147   : > { %v607_v27 = vmul.f32 %v606_v26, %v605_v25 }
 0x159   : > { %v610_v28 = vpop.permute.xlu1 %609 }
 0x15a   : > { %v612_v29 = vadd.f32 %v610_v28, %v607_v27 }
 0x15c   : > { %1906 = vmatmul.mubr.msk.f32.vlgmr.msra.gmra.mrb[2].mxu0 %vm591_vm2, %v612_v29 }
 0x15d   : > { %1910 = vmatprep.mubr.msk.f32.mxu0 %vm2100_vm0, %v2099_v1 }
 0x22f   : > { %v693_v31 = vpop.f32.mrb[2].mxu0 }
 0x230   : > { %v694_v32 = vadd.f32 %v1817_v30, %v693_v31  ;;  %v1907_v33 = vpop.f32.mrb[3].mxu0 }
 0x232   : > { %700 = vrot.lane.b32.xlu0 %v694_v32, %s2103_s29  ;;  %698 = vrot.lane.b32.xlu1 %v694_v32, %s2104_s30  ;;  %s2109_s29 = smov 24  }
 0x236   : > { %702 = vrot.lane.b32.xlu1 %v694_v32, %s2105_s16 }
 0x23a   : > { %708 = vrot.lane.b32.xlu1 %v694_v32, %s2102_s26 }
 0x2a4   : > { %v699_v34 = vpop.permute.xlu1 %698  ;;  %v2256_v35 = vpop.permute.xlu0 %700 }
 0x2a5   : > { %784 = vrot.lane.b32.xlu1 %v699_v34, %s2102_s26 }
 0x2a8   : > { %v2258_v36 = vpop.permute.xlu1 %702 }
 0x2a9   : > { %860 = vrot.lane.b32.xlu1 %v2256_v35, %s2102_s26 }
 0x2ac   : > { %v709_v37 = vpop.permute.xlu1 %708 }
 0x2ad   : > { %936 = vrot.lane.b32.xlu1 %v2258_v36, %s2102_s26  ;;  %1909 = vmatpush3.xpose.msk.msra.mxu0 %vm517_vm1, %v709_v37 }
 0x2ae   : > { %1913 = vmatprep.subr.mxu0 %v2099_v1 }
 0x2b0   : > { %1911 = vmatmul.mubr.msk.f32.vlgmr.msra.gmra.mrb[4].mxu0 %vm517_vm1, %v694_v32 }
 0x2b1   : > { %1915 = vmatprep.mubr.msk.f32.mxu0 %vm2100_vm0, %v2099_v1 }
 0x317   : > { %v785_v38 = vpop.permute.xlu1 %784 }
 0x318   : > { %1914 = vmatpush3.xpose.msk.msra.mxu0 %vm517_vm1, %v785_v38 }
 0x319   : > { %1918 = vmatprep.subr.mxu0 %v2099_v1 }
 0x31b   : > { %1916 = vmatmul.mubr.msk.f32.vlgmr.msra.gmra.mrb[6].mxu0 %vm517_vm1, %v699_v34  ;;  %v861_v39 = vpop.permute.xlu1 %860 }
 0x31c   : > { %1919 = vmatpush3.xpose.msk.msra.mxu0 %vm517_vm1, %v861_v39  ;;  %1920 = vmatprep.mubr.msk.f32.mxu0 %vm2100_vm0, %v2099_v1  ;;  %v1377_v39 = vld [vmem:[%s2459_s7] sm:$0xff] }
 0x31d   : > { %1923 = vmatprep.subr.mxu0 %v2099_v1 }
 0x31f   : > { %1921 = vmatmul.mubr.msk.f32.vlgmr.msra.gmra.mrb[8].mxu0 %vm517_vm1, %v2256_v35  ;;  %v937_v40 = vpop.permute.xlu1 %936 }
 0x320   : > { %1924 = vmatpush3.xpose.msk.msra.mxu0 %vm517_vm1, %v937_v40  ;;  %1925 = vmatprep.mubr.msk.f32.mxu0 %vm2100_vm0, %v2099_v1  ;;  %v1378_v40 = vld [vmem:[%s2459_s7 + $0x8] sm:$0xff] }
 0x321   : > { %1933 = vmatprep.subr.mxu0 %v2099_v1 }
 0x323   : > { %1926 = vmatmul.mubr.msk.f32.vlgmr.msra.gmra.mrb[10].mxu0 %vm517_vm1, %v2258_v36 }
 0x324   : > { %1935 = vmatprep.mubr.msk.f32.mxu0 %vm2100_vm0, %v2099_v1 }
 0x383   : > { %v780_v42 = vpop.f32.mrb[4].mxu0 }
 0x384   : > { %v781_v43 = vadd.f32 %v780_v42, %v704_v41  ;;  %v1912_v44 = vpop.f32.mrb[5].mxu0  ;;  %v2017_v41 = vpack.c.bf16 %v1378_v40, %v1377_v39  ;;  %v1379_v42 = vld [vmem:[%s2459_s7 + $0x10] sm:$0xff] }
 0x386   : > { %v1012_v45 = vsel %vm517_vm1, %v781_v43, -inf }
 0x387   : > { %1013 = vmax.xlane.f32.xlu1 %v1012_v45  ;;  %v1463_v45 = vld [vmem:[%s2461_s9] sm:$0xff] }
 0x3ee   : > { %v856_v47 = vpop.f32.mrb[6].mxu0 }
 0x3ef   : > { %v857_v48 = vadd.f32 %v856_v47, %v705_v46  ;;  %v1917_v49 = vpop.f32.mrb[7].mxu0 }
 0x3f1   : > { %v1015_v51 = vsel %vm517_vm1, %v857_v48, -inf }
 0x3f2   : > { %1016 = vmax.xlane.f32.xlu0 %v1015_v51  ;;  %v932_v52 = vpop.f32.mrb[8].mxu0 }
 0x3f3   : > { %v933_v53 = vadd.f32 %v932_v52, %v706_v50  ;;  %v1922_v54 = vpop.f32.mrb[9].mxu0 }
 0x3f5   : > { %v1018_v56 = vsel %vm517_vm1, %v933_v53, -inf }
 0x3f6   : > { %1019 = vmax.xlane.f32.xlu0 %v1018_v56  ;;  %v1008_v57 = vpop.f32.mrb[10].mxu0 }
 0x3f7   : > { %v1009_v58 = vadd.f32 %v1008_v57, %v707_v55  ;;  %v1927_v59 = vpop.f32.mrb[11].mxu0 }
 0x3f9   : > { %v1021_v60 = vsel %vm517_vm1, %v1009_v58, -inf }
 0x3fa   : > { %1022 = vmax.xlane.f32.xlu1 %v1021_v60 }
 0x40b   : > { %1132 = vrot.lane.b32.xlu1 %v699_v34, %s2106_s28 }
 0x40c   : > { %1056 = vrot.lane.b32.xlu0 %v694_v32, %s2106_s28 }
 0x414   : > { %v1014_v61 = vpop.xlane.xlu1 %1013 }
 0x415   : > { %v1024_v62 = vsub.f32 %v781_v43, %v1014_v61  ;;  %v1380_v43 = vld [vmem:[%s2459_s7 + $0x18] sm:$0xff] }
 0x416   : > { %v2020_v44 = vpack.c.bf16 %v1380_v43, %v1379_v42 }
 0x417   : > { %v1028_v63 = vmul.f32 1.442695, %v1024_v62 }
 0x419   : > { %2073 = vpow2.f32 %v1028_v63  ;;  %v1833_v63 = vld [vmem:[%s2462_s10] ss:$0 sm:$0xff] }
 0x423   : > { %v2074_v0 = vpop.eup %2073 }
 0x424   : > { %v1036_v4 = vsel %vm517_vm1, %v2074_v0, 0.0 }
 0x42b   : > { %1037 = vadd.xlane.f32.xlu0 %v1036_v4 }
 0x47f   : > { %v1017_v5 = vpop.xlane.xlu0 %1016 }
 0x480   : > { %v1025_v6 = vsub.f32 %v857_v48, %v1017_v5 }
 0x482   : > { %v1030_v7 = vmul.f32 1.442695, %v1025_v6 }
 0x483   : > { %v1020_v8 = vpop.xlane.xlu0 %1019 }
 0x484   : > { %2075 = vpow2.f32 %v1030_v7  ;;  %v1026_v9 = vsub.f32 %v933_v53, %v1020_v8 }
 0x486   : > { %v1032_v10 = vmul.f32 1.442695, %v1026_v9  ;;  %v1561_v9 = vld [vmem:[%s2463_s11] sm:$0xff] }
 0x487   : > { %v1057_v11 = vpop.permute.xlu0 %1056  ;;  %v1023_v12 = vpop.xlane.xlu1 %1022 }
 0x488   : > { %2077 = vpow2.f32 %v1032_v10  ;;  %v1027_v14 = vsub.f32 %v1009_v58, %v1023_v12  ;;  %1929 = vmatpush3.msra.mxu1 %v1057_v11  ;;  %v1832_v58 = vld [vmem:[%s2460_s8] ss:$0 sm:$0xff]  ;;  %v1562_v10 = vld [vmem:[%s2463_s11 + $0x8] sm:$0xff]  ;;  %v1563_v11 = vld [vmem:[%s2463_s11 + $0x10] sm:$0xff] }
 0x489   : > { %1938 = vmatprep.subr.mxu1 %v2099_v1  ;;  %v2023_v12 = vpack.c.bf16 %v1562_v10, %v1561_v9 }
 0x48a   : > { %v1034_v15 = vmul.f32 1.442695, %v1027_v14  ;;  %v1564_v14 = vld [vmem:[%s2463_s11 + $0x18] sm:$0xff] }
 0x48b   : > { %v1133_v16 = vpop.permute.xlu1 %1132 }
 0x48c   : > { %2079 = vpow2.f32 %v1034_v15  ;;  %1934 = vmatpush3.msra.mxu0 %v1133_v16  ;;  %v2026_v15 = vpack.c.bf16 %v1564_v14, %v1563_v11  ;;  %v1646_v16 = vld [vmem:[%s2465_s13] sm:$0xff] }
 0x48d   : > { %1943 = vmatprep.subr.mxu0 %v2099_v1 }
 0x48e   : > { %v2076_v17 = vpop.eup %2075 }
 0x48f   : > { %v1039_v18 = vsel %vm517_vm1, %v2076_v17, 0.0 }
 0x490   : > { %1040 = vadd.xlane.f32.xlu1 %v1039_v18  ;;  %v1648_v18 = vld [vmem:[%s2465_s13 + $0x10] sm:$0xff] }
 0x492   : > { %v2078_v19 = vpop.eup %2077 }
 0x493   : > { %v1042_v20 = vsel %vm517_vm1, %v2078_v19, 0.0 }
 0x494   : > { %1043 = vadd.xlane.f32.xlu0 %v1042_v20  ;;  %v1649_v20 = vld [vmem:[%s2465_s13 + $0x18] sm:$0xff] }
 0x496   : > { %v2080_v21 = vpop.eup %2079 }
 0x497   : > { %v1045_v22 = vsel %vm517_vm1, %v2080_v21, 0.0 }
 0x498   : > { %1046 = vadd.xlane.f32.xlu1 %v1045_v22  ;;  %v1650_v22 = vld [vmem:[%s2465_s13 + $0x20] sm:$0xff] }
 0x4a9   : > { %1208 = vrot.lane.b32.xlu1 %v2256_v35, %s2106_s28 }
 0x4aa   : > { %1284 = vrot.lane.b32.xlu0 %v2258_v36, %s2106_s28  ;;  %s2108_s28 = smov 16  }
 0x4b8   : > { %v1038_v23 = vpop.xlane.xlu0 %1037 }
 0x4b9   : > { %2081 = vrcp.f32 %v1038_v23  ;;  %v1651_v23 = vld [vmem:[%s2465_s13 + $0x28] sm:$0xff] }
 0x4c3   : > { %v2082_v24 = vpop.eup %2081 }
 0x4c4   : > { %v1052_v25 = vmul.f32 %v2082_v24, %v2074_v0  ;;  %v2035_v24 = vpack.c.bf16 %v1651_v23, %v1650_v22 }
 0x4c6   : > { %1931 = vmatmul.mubr.msk.f32.vlgmr.msra.gmra.mrb[0].mxu1 %vm517_vm1, %v1052_v25  ;;  %v1652_v25 = vld [vmem:[%s2465_s13 + $0x30] sm:$0xff] }
 0x4c7   : > { %1940 = vmatprep.mubr.msk.f32.mxu1 %vm2100_vm0, %v2099_v1 }
 0x51d   : > { %v1041_v26 = vpop.xlane.xlu1 %1040 }
 0x51e   : > { %2083 = vrcp.f32 %v1041_v26  ;;  %v1653_v26 = vld [vmem:[%s2465_s13 + $0x38] sm:$0xff] }
 0x521   : > { %v1044_v27 = vpop.xlane.xlu0 %1043 }
 0x522   : > { %2085 = vrcp.f32 %v1044_v27  ;;  %v2038_v27 = vpack.c.bf16 %v1653_v26, %v1652_v25 }
 0x525   : > { %v1047_v28 = vpop.xlane.xlu1 %1046  ;;  %v1285_v32 = vpop.permute.xlu0 %1284 }
 0x526   : > { %2087 = vrcp.f32 %v1047_v28  ;;  %v1654_v28 = vld [vmem:[%s2465_s13 + $0x40] sm:$0xff] }
 0x528   : > { %v2084_v29 = vpop.eup %2083 }
 0x529   : > { %v1053_v30 = vmul.f32 %v2084_v29, %v2076_v17  ;;  %v1209_v31 = vpop.permute.xlu1 %1208  ;;  %v1647_v17 = vld [vmem:[%s2465_s13 + $0x8] sm:$0xff] }
 0x52a   : > { %1939 = vmatpush3.msra.mxu1 %v1209_v31  ;;  %v1655_v29 = vld [vmem:[%s2465_s13 + $0x48] sm:$0xff]  ;;  %v1656_v31 = vld [vmem:[%s2465_s13 + $0x50] sm:$0xff] }
 0x52b   : > { %1936 = vmatmul.mubr.msk.f32.vlgmr.msra.gmra.mrb[12].mxu0 %vm517_vm1, %v1053_v30  ;;  %2016 = vmatprep.subr.bf16.mxu1 %v2101_v13  ;;  %v2041_v30 = vpack.c.bf16 %v1655_v29, %v1654_v28 }
 0x52c   : > { %v2086_v33 = vpop.eup %2085  ;;  %1944 = vmatpush3.msra.mxu0 %v1285_v32  ;;  %1945 = vmatprep.mubr.msk.f32.mxu0 %vm2100_vm0, %v2099_v1  ;;  %v1657_v32 = vld [vmem:[%s2465_s13 + $0x58] sm:$0xff] }
 0x52d   : > { %v1054_v34 = vmul.f32 %v2086_v33, %v2078_v19  ;;  %1959 = vmatprep.subr.mxu0 %v2099_v1  ;;  %v2029_v19 = vpack.c.bf16 %v1647_v17, %v1646_v16  ;;  %v2044_v33 = vpack.c.bf16 %v1657_v32, %v1656_v31 }
 0x52f   : > { %1941 = vmatmul.mubr.msk.f32.vlgmr.msra.gmra.mrb[2].mxu1 %vm517_vm1, %v1054_v34  ;;  %v1658_v34 = vld [vmem:[%s2465_s13 + $0x60] sm:$0xff] }
 0x530   : > { %v2088_v35 = vpop.eup %2087  ;;  %1956 = vmatprep.mubr.msk.f32.mxu1 %vm2100_vm0, %v2099_v1  ;;  %2018 = vmatpush3.bf16.msra.mxu1 %v2017_v41 }
 0x531   : > { %v1055_v36 = vmul.f32 %v2088_v35, %v2080_v21  ;;  %2019 = vmatprep.subr.bf16.mxu1 %v2101_v13  ;;  %v2032_v21 = vpack.c.bf16 %v1649_v20, %v1648_v18  ;;  %v1659_v35 = vld [vmem:[%s2465_s13 + $0x68] sm:$0xff] }
 0x533   : > { %1946 = vmatmul.mubr.msk.f32.vlgmr.msra.gmra.mrb[14].mxu0 %vm517_vm1, %v1055_v36  ;;  %v2047_v36 = vpack.c.bf16 %v1659_v35, %v1658_v34 }
 0x534   : > { %1961 = vmatprep.mubr.msk.f32.mxu0 %vm2100_vm0, %v2099_v1  ;;  %2021 = vmatpush3.bf16.msra.mxu1 %v2020_v44 }
 0x535   : > { %2028 = vmatprep.subr.bf16.mxu1 %v2101_v13  ;;  %1960 = vmatpush3.msra.mxu0 %v1463_v45 }
 0x536   : > { %2022 = vmatprep.subr.bf16.mxu0 %v2101_v13 }
 0x537   : > { %1962 = vmatmul.mubr.msk.f32.vlgmr.msra.gmra.mrb[16].mxu0 %vm517_vm1, %v2213_v2 }
 0x538   : > { %1972 = vmatprep.mubr.msk.f32.mxu0 %vm2100_vm0, %v2099_v1  ;;  %2024 = vmatpush3.bf16.msra.mxu0 %v2023_v12 }
 0x539   : > { %2025 = vmatprep.subr.bf16.mxu0 %v2101_v13 }
 0x53c   : > { %2027 = vmatpush3.bf16.msra.mxu0 %v2026_v15 }
 0x599   : > { %v1128_v37 = vpop.f32.mrb[0].mxu1 }
 0x59a   : > { %v1932_v38 = vpop.f32.mrb[1].mxu1 }
 0x5fe   : > { %v1204_v46 = vpop.f32.mrb[12].mxu0 }
 0x5ff   : > { %1361 = vrot.lane.b32.xlu1 %v1204_v46, %s2107_s27  ;;  %v1937_v47 = vpop.f32.mrb[13].mxu0  ;;  %v1660_v46 = vld [vmem:[%s2465_s13 + $0x70] sm:$0xff] }
 0x602   : > { %v1280_v48 = vpop.f32.mrb[2].mxu1 }
 0x603   : > { %1365 = vrot.lane.b32.xlu0 %v1280_v48, %s2108_s28  ;;  %v1942_v49 = vpop.f32.mrb[3].mxu1  ;;  %v1835_v48 = vld [vmem:[%s2464_s12] ss:$0 sm:$0xff]  ;;  %s506_s28 = scalar_lea.vmem %s2467_s15, %s2207_s22 }
 0x606   : > { %v1356_v50 = vpop.f32.mrb[14].mxu0 }
 0x607   : > { %1369 = vrot.lane.b32.xlu1 %v1356_v50, %s2109_s29  ;;  %v1947_v51 = vpop.f32.mrb[15].mxu0 }
 0x60a   : > { %v1537_v0 = vpop.f32.mrb[16].mxu0 }
 0x60b   : > { %v1963_v4 = vpop.f32.mrb[17].mxu0 }
 0x671   : > { %v1362_v52 = vpop.permute.xlu1 %1361 }
 0x672   : > { %v1372_v53 = vsel %vm517_vm1, %v1128_v37, %v1362_v52 }
 0x675   : > { %v1366_v2 = vpop.permute.xlu0 %1365 }
 0x676   : > { %v1374_v54 = vsel %vm1373_vm3, %v1372_v53, %v1366_v2  ;;  %v1837_v53 = vld [vmem:[%s2466_s14] ss:$0 sm:$0xff] }
 0x679   : > { %v1370_v55 = vpop.permute.xlu1 %1369 }
 0x67a   : > { %v1376_v56 = vsel %vm1375_vm4, %v1374_v54, %v1370_v55 }
 0x67b   : > { %1957 = vmatmul.mubr.msk.f32.vlgmr.msra.gmra.mrb[4].mxu1 %vm591_vm2, %v1376_v56 }
 0x67c   : > { %2007 = vmatprep.mubr.msk.f32.mxu1 %vm2100_vm0, %v2099_v1  ;;  %v1538_v1 = vadd.f32 %v1833_v63, %v1537_v0  ;;  %2030 = vmatpush3.bf16.msra.mxu1 %v2029_v19 }
 0x67d   : > { %2031 = vmatprep.subr.bf16.mxu1 %v2101_v13 }
 0x67e   : > { %v1554_v41 = vadd.f32 1.0, %v1538_v1 }
 0x680   : > { %2033 = vmatpush3.bf16.msra.mxu1 %v2032_v21 }
 0x681   : > { %2034 = vmatprep.subr.bf16.mxu1 %v2101_v13 }
 0x684   : > { %2036 = vmatpush3.bf16.msra.mxu1 %v2035_v24 }
 0x685   : > { %2037 = vmatprep.subr.bf16.mxu1 %v2101_v13 }
 0x688   : > { %2039 = vmatpush3.bf16.msra.mxu1 %v2038_v27 }
 0x689   : > { %2040 = vmatprep.subr.bf16.mxu1 %v2101_v13 }
 0x68c   : > { %2042 = vmatpush3.bf16.msra.mxu1 %v2041_v30 }
 0x68d   : > { %2043 = vmatprep.subr.bf16.mxu1 %v2101_v13 }
 0x690   : > { %2045 = vmatpush3.bf16.msra.mxu1 %v2044_v33 }
 0x691   : > { %2046 = vmatprep.subr.bf16.mxu1 %v2101_v13 }
 0x694   : > { %2048 = vmatpush3.bf16.msra.mxu1 %v2047_v36 }
 0x695   : > { %2049 = vmatprep.subr.bf16.mxu1 %v2101_v13  ;;  %v1661_v13 = vld [vmem:[%s2465_s13 + $0x78] sm:$0xff] }
 0x696   : > { %v2050_v47 = vpack.c.bf16 %v1661_v13, %v1660_v46 }
 0x698   : > { %2051 = vmatpush3.bf16.msra.mxu1 %v2050_v47 }
 0x74e   : > { %v1450_v57 = vpop.f32.mrb[4].mxu1 }
 0x74f   : > { %v1454_v59 = vadd.f32 %v1450_v57, %v2221_v3  ;;  %v1958_v60 = vpop.f32.mrb[5].mxu1 }
 0x751   : > { %v2358_v61 = vadd.f32 %v1832_v58, %v1454_v59 }
 0x753   : > { %v1541_v62 = vsel %vm591_vm2, %v2358_v61, 0.0 }
 0x754   : > { %1542 = vadd.xlane.f32.xlu0 %v1541_v62 }
 0x76a   : > { %1557 = vrot.lane.b32.xlu0 %v1538_v1, %s2102_s26 }
 0x7e1   : > { %v1543_v5 = vpop.xlane.xlu0 %1542 }
 0x7e2   : > { %v1544_v6 = vmul.f32 0.03125, %v1543_v5 }
 0x7e4   : > { %v1545_v3 = vsub.f32 %v2358_v61, %v1544_v6 }
 0x7e5   : > { %v1558_v43 = vpop.permute.xlu0 %1557 }
 0x7e6   : > { %v1546_v7 = vmul.f32 %v1545_v3, %v1545_v3 }
 0x7e8   : > { %v1547_v8 = vsel %vm591_vm2, %v1546_v7, 0.0 }
 0x7e9   : > { %1548 = vadd.xlane.f32.xlu1 %v1547_v8 }
 0x876   : > { %v1549_v37 = vpop.xlane.xlu1 %1548 }
 0x877   : > { %v1550_v38 = vmul.f32 0.03125, %v1549_v37 }
 0x879   : > { %v1551_v39 = vadd.f32 1e-05, %v1550_v38 }
 0x87b   : > { %2089 = vrsqrt.f32 %v1551_v39 }
 0x885   : > { %v2090_v40 = vpop.eup %2089 }
 0x886   : > { %v1553_v42 = vmul.f32 %v2090_v40, %v1545_v3 }
 0x888   : > { %v1555_v44 = vmul.f32 %v1554_v41, %v1553_v42 }
 0x88a   : > { %v1560_v45 = vadd.f32 %v1558_v43, %v1555_v44 }
 0x88c   : > { %1973 = vmatmul.mubr.msk.f32.vlgmr.msra.gmra.mrb[18].mxu0 %vm591_vm2, %v1560_v45 }
 0x95f   : > { %v1641_v49 = vpop.f32.mrb[18].mxu0 }
 0x960   : > { %v1642_v50 = vadd.f32 %v1835_v48, %v1641_v49  ;;  %v1974_v51 = vpop.f32.mrb[19].mxu0 }
 0x962   : > { %v1645_v52 = vmax.f32 %v1642_v50, 0.0 }
 0x964   : > { %2008 = vmatmul.mubr.f32.vlgmr.msra.gmra.mrb[6].mxu1 %v1645_v52 }
 0xa37   : > { %v1728_v2 = vpop.f32.mrb[6].mxu1 }
 0xa38   : > { %v1732_v54 = vadd.f32 %v1728_v2, %v2358_v61  ;;  %v2009_v55 = vpop.f32.mrb[7].mxu1 }
 0xa3a   : > { %v1740_v56 = vadd.f32 %v1837_v53, %v1732_v54 }
 0xa3c   : > { %1741 = vst.msk [vmem:[%s506_s28] sm:$0xff] %vm591_vm2, %v1740_v56 }
 0xa3d PF: > { %s25_s18 = sadd.s32 1, %s2097_s18  }
 0xa3e   : > { %p22_p4 = scmp.ge.s32.totalorder %s25_s18, 4  }
 0xa40   :  { %24 = sbr.rel (!%p22_p4) target bundleno = 1 (0x1), region = 113 }

// kernel: _lambda_.9
= control target key start
LH: loop header
LB: loop body
LE: loop exit
PB: predicated region body
PF: predicated region fallthrough
CT: control target
= control target key end

     0   :  { %vm33_vm0 = vcmask 261120   ;;  %vm209_vm1 = vcmask 23552   ;;  %s348_s1 = inlined_call_operand.vmem [shape: f32[32,32], index: 1, kind: input, shape index: {}]   ;;  %s349_s0 = inlined_call_operand.vmem [shape: f32[16,32], index: 0, kind: input, shape index: {}]   ;;  %s350_s3 = inlined_call_operand.vmem [shape: f32[32,3], index: 3, kind: input, shape index: {}]   ;;  %s351_s2 = inlined_call_operand.vmem [shape: f32[1,32], index: 2, kind: input, shape index: {}]   ;;  %s352_s4 = inlined_call_operand.vmem [shape: f32[1,3], index: 4, kind: input, shape index: {}]   ;;  %s353_s5 = inlined_call_operand.vmem [shape: f32[16,3], index: 5, kind: output, shape index: {}]  }
   0x1   :  { %v22_v0 = vld [vmem:[%s348_s1] sm:$0xff]  ;;  %v23_v1 = vld [vmem:[%s348_s1 + $0x8] sm:$0xff]  ;;  %v24_v2 = vld [vmem:[%s348_s1 + $0x10] sm:$0xff] }
   0x2   :  { %v256_v3 = vpack.c.bf16 %v23_v1, %v22_v0  ;;  %v25_v4 = vld [vmem:[%s348_s1 + $0x18] sm:$0xff]  ;;  %v20_v5 = vld [vmem:[%s349_s0] sm:$0xff]  ;;  %v118_v8 = vld [vmem:[%s350_s3 + $0x8] sm:$0xff] }
   0x3   :  { %v260_v6 = vpack.c.bf16 %v25_v4, %v24_v2  ;;  %242 = vmatprep.mubr.msk.f32.mxu0 %vm33_vm0, %v20_v5  ;;  %v117_v7 = vld [vmem:[%s350_s3] sm:$0xff]  ;;  %v21_v10 = vld [vmem:[%s349_s0 + $0x8] sm:$0xff]  ;;  %v119_v11 = vld [vmem:[%s350_s3 + $0x10] sm:$0xff] }
   0x4   :  { %257 = vmatprep.subr.bf16.mxu0 %v256_v3  ;;  %v264_v9 = vpack.c.bf16 %v118_v8, %v117_v7  ;;  %v120_v12 = vld [vmem:[%s350_s3 + $0x18] sm:$0xff]  ;;  %v216_v14 = vld [vmem:[%s351_s2] ss:$0 sm:$0xff] }
   0x5   :  { %259 = vmatpush3.bf16.msra.mxu0 %v256_v3  ;;  %v268_v13 = vpack.c.bf16 %v120_v12, %v119_v11  ;;  %v219_v21 = vld [vmem:[%s352_s4] ss:$0 sm:$0xff] }
   0x6   :  { %261 = vmatprep.subr.bf16.mxu0 %v260_v6  ;;  %265 = vmatprep.subr.bf16.mxu1 %v264_v9 }
   0x7   :  { %267 = vmatpush3.bf16.msra.mxu1 %v264_v9 }
   0x8   :  { %269 = vmatprep.subr.bf16.mxu1 %v268_v13 }
   0x9   :  { %263 = vmatpush3.bf16.msra.mxu0 %v260_v6 }
   0xb   :  { %271 = vmatpush3.bf16.msra.mxu1 %v268_v13 }
   0xc   :  { %243 = vmatmul.mubr.msk.f32.vlgmr.msra.gmra.mrb[0].mxu0 %vm33_vm0, %v21_v10 }
  0xdf   :  { %v244_v15 = vpop.f32.mrb[0].mxu0 }
  0xe0   :  { %v112_v16 = vadd.f32 %v244_v15, %v216_v14  ;;  %v106_v17 = vpop.f32.mrb[1].mxu0 }
  0xe1   :  { %v107_v18 = vadd.f32 %v216_v14, %v106_v17 }
  0xe2   :  { %v116_v20 = vmax.f32 %v112_v16, 0.0 }
  0xe3   :  { %v115_v19 = vmax.f32 %v107_v18, 0.0 }
  0xe5   :  { %253 = vmatprep.mubr.msk.f32.mxu1 %vm33_vm0, %v115_v19 }
  0xe6   :  { %254 = vmatmul.mubr.msk.f32.vlgmr.msra.gmra.mrb[0].mxu1 %vm33_vm0, %v116_v20 }
 0x1b9   :  { %v255_v22 = vpop.f32.mrb[0].mxu1 }
 0x1ba   :  { %v206_v23 = vadd.f32 %v255_v22, %v219_v21  ;;  %v200_v24 = vpop.f32.mrb[1].mxu1 }
 0x1bb   :  { %v201_v25 = vadd.f32 %v219_v21, %v200_v24 }
 0x1bc   :  { %211 = vst.msk [vmem:[%s353_s5 + $0x8] sm:$0xff] %vm209_vm1, %v206_v23 }
 0x1bd   :  { %210 = vst.msk [vmem:[%s353_s5] sm:$0xff] %vm209_vm1, %v201_v25 }

</bundles_post_ra>
